<compile_context>
chip_gen: v5e
topology: v5e:2x2
jax: 0.10.0
libtpu: 0.0.40
codegen_flags: <defaults>
</compile_context>

<pallas_src>
import math

import jax
import jax.numpy as jnp
from jax.experimental import pallas as pl
from jax.experimental.pallas import tpu as pltpu

LANES = 128


def _round_up(x, m):
    return (x + m - 1) // m * m


# ---------------------------------------------------------------------------
# Kernel 1: tiled matmul + folded-BN affine + ReLU6 (used for the fused 1x1s)
# ---------------------------------------------------------------------------
def _matmul_bn_relu6_kernel(a_ref, w_ref, s_ref, b_ref, o_ref, acc_ref):
    @pl.when(pl.program_id(2) == 0)
    def _init():
        acc_ref[...] = jnp.zeros_like(acc_ref)

    acc_ref[...] += jnp.dot(a_ref[...], w_ref[...],
                            preferred_element_type=jnp.float32)

    @pl.when(pl.program_id(2) == pl.num_programs(2) - 1)
    def _finalize():
        y = acc_ref[...] * s_ref[...] + b_ref[...]
        o_ref[...] = jnp.clip(y, 0.0, 6.0).astype(o_ref.dtype)


def matmul_bn_relu6(a, wmat, scale, bias, out_dtype=jnp.float32,
                    tm=128, tn=LANES):
    """clip((a @ wmat) * scale + bias, 0, 6);  a:(M,K), wmat:(K,Cout)."""
    M, K = a.shape
    Cout = wmat.shape[1]
    Mp = _round_up(M, tm)
    Np = _round_up(Cout, tn)
    Kp = _round_up(K, 8)
    if Kp <= 2048:
        tk = Kp                       # single K step (fits VMEM comfortably)
    else:
        tk = 512
        Kp = _round_up(Kp, tk)

    a_p = jnp.pad(a.astype(jnp.bfloat16), ((0, Mp - M), (0, Kp - K)))
    w_p = jnp.pad(wmat.astype(jnp.bfloat16), ((0, Kp - K), (0, Np - Cout)))
    s_p = jnp.pad(scale.reshape(1, Cout).astype(jnp.float32),
                  ((0, 0), (0, Np - Cout)))
    b_p = jnp.pad(bias.reshape(1, Cout).astype(jnp.float32),
                  ((0, 0), (0, Np - Cout)))

    out = pl.pallas_call(
        _matmul_bn_relu6_kernel,
        out_shape=jax.ShapeDtypeStruct((Mp, Np), out_dtype),
        grid=(Mp // tm, Np // tn, Kp // tk),
        in_specs=[
            pl.BlockSpec((tm, tk), lambda i, j, k: (i, k)),
            pl.BlockSpec((tk, tn), lambda i, j, k: (k, j)),
            pl.BlockSpec((1, tn), lambda i, j, k: (0, j)),
            pl.BlockSpec((1, tn), lambda i, j, k: (0, j)),
        ],
        out_specs=pl.BlockSpec((tm, tn), lambda i, j, k: (i, j)),
        scratch_shapes=[pltpu.VMEM((tm, tn), jnp.float32)],
        compiler_params=pltpu.CompilerParams(
            dimension_semantics=("parallel", "parallel", "arbitrary")),
    )(a_p, w_p, s_p, b_p)
    return out[:M, :Cout]


# ---------------------------------------------------------------------------
# Kernel 2: direct 1 x kw conv (stride 1) + BN + ReLU6, taps gathered in VMEM
# ---------------------------------------------------------------------------
def _make_conv1d_kernel(kw, Wo, tr):
    def kernel(x_ref, w_ref, s_ref, b_ref, o_ref):
        x = x_ref[...]                                      # (tr, Wp, Cin)
        rows = []
        for r in range(tr):
            taps = [x[r, j:j + Wo, :] for j in range(kw)]   # kw x (Wo, Cin)
            rows.append(taps[0] if kw == 1 else jnp.concatenate(taps, axis=-1))
        patch = rows[0] if tr == 1 else jnp.concatenate(rows, axis=0)
        acc = jnp.dot(patch, w_ref[...], preferred_element_type=jnp.float32)
        y = acc * s_ref[...] + b_ref[...]
        o_ref[...] = jnp.clip(y, 0.0, 6.0).astype(o_ref.dtype)
    return kernel


def conv1d_bn_relu6(x_rows, w1d, scale, bias, pad, out_dtype=jnp.bfloat16,
                    tn=LANES):
    """1 x kw conv (stride 1, zero pad `pad`) + BN + ReLU6 along axis 1 of
    x_rows:(R, W, Cin).  w1d:(kw, Cin, Cout)."""
    R, W, Cin = x_rows.shape
    kw, _, Cout = w1d.shape
    Wp = W + 2 * pad
    Wo = Wp - kw + 1
    Np = _round_up(Cout, tn)

    base = 8 // math.gcd(Wo, 8)          # rows/block so that tr*Wo % 8 == 0
    tr = base
    while tr * Wo < 128:                 # aim for >=128 output rows per dot
        tr += base
    Rp = _round_up(R, tr)

    x_p = jnp.pad(x_rows.astype(jnp.bfloat16),
                  ((0, Rp - R), (pad, pad), (0, 0)))
    w_p = jnp.pad(w1d.reshape(kw * Cin, Cout).astype(jnp.bfloat16),
                  ((0, 0), (0, Np - Cout)))
    s_p = jnp.pad(scale.reshape(1, Cout).astype(jnp.float32),
                  ((0, 0), (0, Np - Cout)))
    b_p = jnp.pad(bias.reshape(1, Cout).astype(jnp.float32),
                  ((0, 0), (0, Np - Cout)))

    out = pl.pallas_call(
        _make_conv1d_kernel(kw, Wo, tr),
        out_shape=jax.ShapeDtypeStruct((Rp * Wo, Np), out_dtype),
        grid=(Rp // tr, Np // tn),
        in_specs=[
            pl.BlockSpec((tr, Wp, Cin), lambda r, n: (r, 0, 0)),
            pl.BlockSpec((kw * Cin, tn), lambda r, n: (0, n)),
            pl.BlockSpec((1, tn), lambda r, n: (0, n)),
            pl.BlockSpec((1, tn), lambda r, n: (0, n)),
        ],
        out_specs=pl.BlockSpec((tr * Wo, tn), lambda r, n: (r, n)),
        compiler_params=pltpu.CompilerParams(
            dimension_semantics=("parallel", "parallel")),
    )(x_p, w_p, s_p, b_p)
    return out.reshape(Rp, Wo, Np)[:R, :, :Cout]


# ---------------------------------------------------------------------------
# Kernel 3: direct 3x3 stride-2 conv + BN + ReLU6 (even/odd W-phase inputs)
# ---------------------------------------------------------------------------
def _make_conv3x3s2_kernel(Wo):
    def kernel(x00, x01, x10, x11, x20, x21, w_ref, s_ref, b_ref, o_ref):
        rows = (x00, x01, x10, x11, x20, x21)   # (row-tap i) x (W-phase 0/1)
        slabs = []
        for i in range(3):
            for j in range(3):
                ph, dj = j % 2, j // 2
                row = rows[i * 2 + ph][0, 0]     # (Wphase, Cin)
                slabs.append(row[dj:dj + Wo, :])
        patch = jnp.concatenate(slabs, axis=-1)  # (Wo, 9*Cin)
        acc = jnp.dot(patch, w_ref[...], preferred_element_type=jnp.float32)
        y = acc * s_ref[...] + b_ref[...]
        o_ref[0, 0] = jnp.clip(y, 0.0, 6.0).astype(o_ref.dtype)
    return kernel


def conv3x3s2_bn_relu6(x, w, scale, bias, out_dtype=jnp.float32, tn=LANES):
    """3x3 stride-2 valid conv + BN + ReLU6.  x:(N,H,W,Cin), w:(3,3,Cin,Cout)."""
    N, H, W, Cin = x.shape
    Cout = w.shape[-1]
    Ho = (H - 3) // 2 + 1
    Wo = (W - 3) // 2 + 1
    Np = _round_up(Cout, tn)

    phases = (x[:, :, 0::2, :].astype(jnp.bfloat16),
              x[:, :, 1::2, :].astype(jnp.bfloat16))
    w_p = jnp.pad(w.reshape(9 * Cin, Cout).astype(jnp.bfloat16),
                  ((0, 0), (0, Np - Cout)))
    s_p = jnp.pad(scale.reshape(1, Cout).astype(jnp.float32),
                  ((0, 0), (0, Np - Cout)))
    b_p = jnp.pad(bias.reshape(1, Cout).astype(jnp.float32),
                  ((0, 0), (0, Np - Cout)))

    in_specs, operands = [], []
    for i in range(3):
        for ph in range(2):
            in_specs.append(
                pl.BlockSpec((1, 1, phases[ph].shape[2], Cin),
                             lambda n, ho, c, i=i: (n, 2 * ho + i, 0, 0)))
            operands.append(phases[ph])
    in_specs += [
        pl.BlockSpec((9 * Cin, tn), lambda n, ho, c: (0, c)),
        pl.BlockSpec((1, tn), lambda n, ho, c: (0, c)),
        pl.BlockSpec((1, tn), lambda n, ho, c: (0, c)),
    ]

    out = pl.pallas_call(
        _make_conv3x3s2_kernel(Wo),
        out_shape=jax.ShapeDtypeStruct((N, Ho, Wo, Np), out_dtype),
        grid=(N, Ho, Np // tn),
        in_specs=in_specs,
        out_specs=pl.BlockSpec((1, 1, Wo, tn), lambda n, ho, c: (n, ho, 0, c)),
        compiler_params=pltpu.CompilerParams(
            dimension_semantics=("parallel", "parallel", "parallel")),
    )(*operands, w_p, s_p, b_p)
    return out[..., :Cout]


# ---------------------------------------------------------------------------
# Kernel 4: MaxPool 3x3 / stride 2 (reads x once via the same phase/tap refs)
# ---------------------------------------------------------------------------
def _make_maxpool3x3s2_kernel(Wo):
    def kernel(x00, x01, x10, x11, x20, x21, o_ref):
        rows = (x00, x01, x10, x11, x20, x21)
        m = None
        for i in range(3):
            for j in range(3):
                ph, dj = j % 2, j // 2
                s = rows[i * 2 + ph][0, 0][dj:dj + Wo, :]
                m = s if m is None else jnp.maximum(m, s)
        o_ref[0, 0] = m.astype(o_ref.dtype)
    return kernel


def maxpool3x3_s2(x):
    """MaxPool2d(kernel_size=3, stride=2, padding=0).  x:(N,H,W,C)."""
    N, H, W, C = x.shape
    Ho = (H - 3) // 2 + 1
    Wo = (W - 3) // 2 + 1
    phases = (x[:, :, 0::2, :].astype(jnp.float32),
              x[:, :, 1::2, :].astype(jnp.float32))

    in_specs, operands = [], []
    for i in range(3):
        for ph in range(2):
            in_specs.append(
                pl.BlockSpec((1, 1, phases[ph].shape[2], C),
                             lambda n, ho, i=i: (n, 2 * ho + i, 0, 0)))
            operands.append(phases[ph])

    return pl.pallas_call(
        _make_maxpool3x3s2_kernel(Wo),
        out_shape=jax.ShapeDtypeStruct((N, Ho, Wo, C), jnp.float32),
        grid=(N, Ho),
        in_specs=in_specs,
        out_specs=pl.BlockSpec((1, 1, Wo, C), lambda n, ho: (n, ho, 0, 0)),
        compiler_params=pltpu.CompilerParams(
            dimension_semantics=("parallel", "parallel")),
    )(*operands)


# ---------------------------------------------------------------------------
# Deterministic synthetic parameters (Conv bias + BatchNorm folded to scale/bias)
# ---------------------------------------------------------------------------
def make_conv_bn_params(key, cin, cout, kh, kw):
    k1, k2, k3, k4, k5, k6 = jax.random.split(key, 6)
    w = jax.random.normal(k1, (kh, kw, cin, cout), jnp.float32) * 0.1
    conv_b = jax.random.normal(k2, (cout,), jnp.float32) * 0.1
    gamma = 1.0 + 0.1 * jax.random.normal(k3, (cout,), jnp.float32)
    beta = 0.1 * jax.random.normal(k4, (cout,), jnp.float32)
    mean = 0.1 * jax.random.normal(k5, (cout,), jnp.float32)
    var = jnp.abs(jax.random.normal(k6, (cout,), jnp.float32)) + 0.5
    eps = 1e-5  # BatchNorm2d default
    scale = gamma / jnp.sqrt(var + eps)
    bias = beta + scale * (conv_b - mean)
    return w, scale, bias


def make_params(key, in_channels, c1r, c1, c2r, c2):
    keys = jax.random.split(key, 6)
    return {
        "b1_1": make_conv_bn_params(keys[0], in_channels, c1r, 1, 1),
        "b1_2": make_conv_bn_params(keys[1], c1r, c1, 3, 3),
        "b2_1": make_conv_bn_params(keys[2], in_channels, c2r, 1, 1),
        "b2_2": make_conv_bn_params(keys[3], c2r, c2r, 1, 7),
        "b2_3": make_conv_bn_params(keys[4], c2r, c2r, 7, 1),
        "b2_4": make_conv_bn_params(keys[5], c2r, c2, 3, 3),
    }


# ---------------------------------------------------------------------------
# Module forward
# ---------------------------------------------------------------------------
def inception_v3_module_e(x_nchw, params):
    x = jnp.transpose(x_nchw, (0, 2, 3, 1))            # NCHW -> NHWC
    N, H, W, Cin = x.shape

    # Fused 1x1 ConvBNReLU6 of branch1 + branch2 (x read once, one matmul).
    w11, s11, b11 = params["b1_1"]
    w21, s21, b21 = params["b2_1"]
    c1r, c2r = w11.shape[-1], w21.shape[-1]
    w_cat = jnp.concatenate([w11[0, 0], w21[0, 0]], axis=-1)   # (Cin, c1r+c2r)
    s_cat = jnp.concatenate([s11, s21])
    b_cat = jnp.concatenate([b11, b21])
    y = matmul_bn_relu6(x.reshape(N * H * W, Cin), w_cat, s_cat, b_cat,
                        out_dtype=jnp.bfloat16)
    y = y.reshape(N, H, W, c1r + c2r)
    b1, b2 = y[..., :c1r], y[..., c1r:]

    # branch1: 3x3 / stride 2
    b1 = conv3x3s2_bn_relu6(b1, *params["b1_2"], out_dtype=jnp.float32)

    # branch2: 1x7 (pad (0,3)) -> 7x1 (pad (3,0)) -> 3x3 / stride 2
    w17, s17, bias17 = params["b2_2"]
    b2 = conv1d_bn_relu6(b2.reshape(N * H, W, c2r), w17[0], s17, bias17,
                         pad=3, out_dtype=jnp.bfloat16).reshape(N, H, W, c2r)
    w71, s71, bias71 = params["b2_3"]
    b2t = jnp.transpose(b2, (0, 2, 1, 3)).reshape(N * W, H, c2r)
    b2t = conv1d_bn_relu6(b2t, w71[:, 0], s71, bias71,
                          pad=3, out_dtype=jnp.bfloat16)
    b2 = jnp.transpose(b2t.reshape(N, W, H, c2r), (0, 2, 1, 3))
    b2 = conv3x3s2_bn_relu6(b2, *params["b2_4"], out_dtype=jnp.float32)

    # branch3: MaxPool2d(3, stride=2)
    b3 = maxpool3x3_s2(x)

    # TODO(synk): writing each branch directly into the concat slab via
    # channel-offset out_specs needs tile-aligned per-branch channel counts;
    # with 16/16/8 channels a plain concat is used instead.
    out = jnp.concatenate([b1, b2, b3], axis=-1)       # dim=1 in NCHW terms
    return jnp.transpose(out, (0, 3, 1, 2))            # NHWC -> NCHW


if __name__ == "__main__":
    N, Cin, H, W = 2, 8, 16, 16
    c1r, c1, c2r, c2 = 8, 16, 8, 16

    key = jax.random.PRNGKey(0)
    kx, kp = jax.random.split(key)
    x = jax.random.normal(kx, (N, Cin, H, W), jnp.float32)
    params = make_params(kp, Cin, c1r, c1, c2r, c2)

    out = jax.jit(inception_v3_module_e)(x, params)
    out = jax.block_until_ready(out)

    Ho = (H - 3) // 2 + 1
    expected = (N, c1 + c2 + Cin, Ho, Ho)
    assert out.shape == expected, (out.shape, expected)
    assert bool(jnp.all(jnp.isfinite(out)))
    print("KERNEL_OK")
</pallas_src>

<mosaic_0001>
module attributes {stable_mosaic.version = 11 : i64} {
  func.func @kernel(%arg0: i32, %arg1: i32, %arg2: memref<1x1x8x8xf32, #tpu.memory_space<vmem>>, %arg3: memref<1x1x8x8xf32, #tpu.memory_space<vmem>>, %arg4: memref<1x1x8x8xf32, #tpu.memory_space<vmem>>, %arg5: memref<1x1x8x8xf32, #tpu.memory_space<vmem>>, %arg6: memref<1x1x8x8xf32, #tpu.memory_space<vmem>>, %arg7: memref<1x1x8x8xf32, #tpu.memory_space<vmem>>, %arg8: memref<1x1x7x8xf32, #tpu.memory_space<vmem>>) attributes {dimension_semantics = [#tpu.dimension_semantics<parallel>, #tpu.dimension_semantics<parallel>], iteration_bounds = array<i64: 2, 7>, scalar_prefetch = 0 : i64, scratch_operands = 0 : i64, tpu.core_type = #tpu.core_type<tc>, window_params = [{transform_indices = @transform_0, window_bounds = array<i64: 1, 1, 8, 8>}, {transform_indices = @transform_1, window_bounds = array<i64: 1, 1, 8, 8>}, {transform_indices = @transform_2, window_bounds = array<i64: 1, 1, 8, 8>}, {transform_indices = @transform_3, window_bounds = array<i64: 1, 1, 8, 8>}, {transform_indices = @transform_4, window_bounds = array<i64: 1, 1, 8, 8>}, {transform_indices = @transform_5, window_bounds = array<i64: 1, 1, 8, 8>}, {transform_indices = @transform_6, window_bounds = array<i64: 1, 1, 7, 8>}]} {
    %c0 = arith.constant 0 : index
    %c0_0 = arith.constant 0 : index
    %c0_1 = arith.constant 0 : index
    %c0_2 = arith.constant 0 : index
    %0 = vector.load %arg2[%c0, %c0_0, %c0_1, %c0_2] : memref<1x1x8x8xf32, #tpu.memory_space<vmem>>, vector<1x1x8x8xf32>
    %1 = vector.shape_cast %0 : vector<1x1x8x8xf32> to vector<8x8xf32>
    %2 = vector.extract_strided_slice %1 {offsets = [0, 0], sizes = [7, 8], strides = [1, 1]} : vector<8x8xf32> to vector<7x8xf32>
    %c0_3 = arith.constant 0 : index
    %c0_4 = arith.constant 0 : index
    %c0_5 = arith.constant 0 : index
    %c0_6 = arith.constant 0 : index
    %3 = vector.load %arg3[%c0_3, %c0_4, %c0_5, %c0_6] : memref<1x1x8x8xf32, #tpu.memory_space<vmem>>, vector<1x1x8x8xf32>
    %4 = vector.shape_cast %3 : vector<1x1x8x8xf32> to vector<8x8xf32>
    %5 = vector.extract_strided_slice %4 {offsets = [0, 0], sizes = [7, 8], strides = [1, 1]} : vector<8x8xf32> to vector<7x8xf32>
    %6 = arith.maximumf %2, %5 : vector<7x8xf32>
    %c0_7 = arith.constant 0 : index
    %c0_8 = arith.constant 0 : index
    %c0_9 = arith.constant 0 : index
    %c0_10 = arith.constant 0 : index
    %7 = vector.load %arg2[%c0_7, %c0_8, %c0_9, %c0_10] : memref<1x1x8x8xf32, #tpu.memory_space<vmem>>, vector<1x1x8x8xf32>
    %8 = vector.shape_cast %7 : vector<1x1x8x8xf32> to vector<8x8xf32>
    %9 = vector.extract_strided_slice %8 {offsets = [1, 0], sizes = [7, 8], strides = [1, 1]} : vector<8x8xf32> to vector<7x8xf32>
    %10 = arith.maximumf %6, %9 : vector<7x8xf32>
    %c0_11 = arith.constant 0 : index
    %c0_12 = arith.constant 0 : index
    %c0_13 = arith.constant 0 : index
    %c0_14 = arith.constant 0 : index
    %11 = vector.load %arg4[%c0_11, %c0_12, %c0_13, %c0_14] : memref<1x1x8x8xf32, #tpu.memory_space<vmem>>, vector<1x1x8x8xf32>
    %12 = vector.shape_cast %11 : vector<1x1x8x8xf32> to vector<8x8xf32>
    %13 = vector.extract_strided_slice %12 {offsets = [0, 0], sizes = [7, 8], strides = [1, 1]} : vector<8x8xf32> to vector<7x8xf32>
    %14 = arith.maximumf %10, %13 : vector<7x8xf32>
    %c0_15 = arith.constant 0 : index
    %c0_16 = arith.constant 0 : index
    %c0_17 = arith.constant 0 : index
    %c0_18 = arith.constant 0 : index
    %15 = vector.load %arg5[%c0_15, %c0_16, %c0_17, %c0_18] : memref<1x1x8x8xf32, #tpu.memory_space<vmem>>, vector<1x1x8x8xf32>
    %16 = vector.shape_cast %15 : vector<1x1x8x8xf32> to vector<8x8xf32>
    %17 = vector.extract_strided_slice %16 {offsets = [0, 0], sizes = [7, 8], strides = [1, 1]} : vector<8x8xf32> to vector<7x8xf32>
    %18 = arith.maximumf %14, %17 : vector<7x8xf32>
    %c0_19 = arith.constant 0 : index
    %c0_20 = arith.constant 0 : index
    %c0_21 = arith.constant 0 : index
    %c0_22 = arith.constant 0 : index
    %19 = vector.load %arg4[%c0_19, %c0_20, %c0_21, %c0_22] : memref<1x1x8x8xf32, #tpu.memory_space<vmem>>, vector<1x1x8x8xf32>
    %20 = vector.shape_cast %19 : vector<1x1x8x8xf32> to vector<8x8xf32>
    %21 = vector.extract_strided_slice %20 {offsets = [1, 0], sizes = [7, 8], strides = [1, 1]} : vector<8x8xf32> to vector<7x8xf32>
    %22 = arith.maximumf %18, %21 : vector<7x8xf32>
    %c0_23 = arith.constant 0 : index
    %c0_24 = arith.constant 0 : index
    %c0_25 = arith.constant 0 : index
    %c0_26 = arith.constant 0 : index
    %23 = vector.load %arg6[%c0_23, %c0_24, %c0_25, %c0_26] : memref<1x1x8x8xf32, #tpu.memory_space<vmem>>, vector<1x1x8x8xf32>
    %24 = vector.shape_cast %23 : vector<1x1x8x8xf32> to vector<8x8xf32>
    %25 = vector.extract_strided_slice %24 {offsets = [0, 0], sizes = [7, 8], strides = [1, 1]} : vector<8x8xf32> to vector<7x8xf32>
    %26 = arith.maximumf %22, %25 : vector<7x8xf32>
    %c0_27 = arith.constant 0 : index
    %c0_28 = arith.constant 0 : index
    %c0_29 = arith.constant 0 : index
    %c0_30 = arith.constant 0 : index
    %27 = vector.load %arg7[%c0_27, %c0_28, %c0_29, %c0_30] : memref<1x1x8x8xf32, #tpu.memory_space<vmem>>, vector<1x1x8x8xf32>
    %28 = vector.shape_cast %27 : vector<1x1x8x8xf32> to vector<8x8xf32>
    %29 = vector.extract_strided_slice %28 {offsets = [0, 0], sizes = [7, 8], strides = [1, 1]} : vector<8x8xf32> to vector<7x8xf32>
    %30 = arith.maximumf %26, %29 : vector<7x8xf32>
    %c0_31 = arith.constant 0 : index
    %c0_32 = arith.constant 0 : index
    %c0_33 = arith.constant 0 : index
    %c0_34 = arith.constant 0 : index
    %31 = vector.load %arg6[%c0_31, %c0_32, %c0_33, %c0_34] : memref<1x1x8x8xf32, #tpu.memory_space<vmem>>, vector<1x1x8x8xf32>
    %32 = vector.shape_cast %31 : vector<1x1x8x8xf32> to vector<8x8xf32>
    %33 = vector.extract_strided_slice %32 {offsets = [1, 0], sizes = [7, 8], strides = [1, 1]} : vector<8x8xf32> to vector<7x8xf32>
    %34 = arith.maximumf %30, %33 : vector<7x8xf32>
    %c0_35 = arith.constant 0 : index
    %c0_36 = arith.constant 0 : index
    %c0_37 = arith.constant 0 : index
    %c0_38 = arith.constant 0 : index
    %35 = vector.load %arg8[%c0_35, %c0_36, %c0_37, %c0_38] : memref<1x1x7x8xf32, #tpu.memory_space<vmem>>, vector<1x1x7x8xf32>
    %36 = vector.shape_cast %35 : vector<1x1x7x8xf32> to vector<7x8xf32>
    %37 = vector.shape_cast %34 : vector<7x8xf32> to vector<1x1x7x8xf32>
    tpu.vector_store %arg8[%c0_35, %c0_36, %c0_37, %c0_38], %37 {strides = array<i32>} : memref<1x1x7x8xf32, #tpu.memory_space<vmem>>, vector<1x1x7x8xf32>,
    return
  }
  func.func @transform_0(%arg0: i32, %arg1: i32) -> (i32, i32, i32, i32) {
    %c2_i32 = arith.constant 2 : i32
    %0 = arith.muli %c2_i32, %arg1 : i32
    %c0_i32 = arith.constant 0 : i32
    %1 = arith.addi %0, %c0_i32 : i32
    %c0_i32_0 = arith.constant 0 : i32
    %c0_i32_1 = arith.constant 0 : i32
    %c0_i32_2 = arith.constant 0 : i32
    return %arg0, %1, %c0_i32_0, %c0_i32_1 : i32, i32, i32, i32
  }
  func.func @transform_1(%arg0: i32, %arg1: i32) -> (i32, i32, i32, i32) {
    %c2_i32 = arith.constant 2 : i32
    %0 = arith.muli %c2_i32, %arg1 : i32
    %c0_i32 = arith.constant 0 : i32
    %1 = arith.addi %0, %c0_i32 : i32
    %c0_i32_0 = arith.constant 0 : i32
    %c0_i32_1 = arith.constant 0 : i32
    %c0_i32_2 = arith.constant 0 : i32
    return %arg0, %1, %c0_i32_0, %c0_i32_1 : i32, i32, i32, i32
  }
  func.func @transform_2(%arg0: i32, %arg1: i32) -> (i32, i32, i32, i32) {
    %c2_i32 = arith.constant 2 : i32
    %0 = arith.muli %c2_i32, %arg1 : i32
    %c1_i32 = arith.constant 1 : i32
    %1 = arith.addi %0, %c1_i32 : i32
    %c0_i32 = arith.constant 0 : i32
    %c0_i32_0 = arith.constant 0 : i32
    %c0_i32_1 = arith.constant 0 : i32
    return %arg0, %1, %c0_i32, %c0_i32_0 : i32, i32, i32, i32
  }
  func.func @transform_3(%arg0: i32, %arg1: i32) -> (i32, i32, i32, i32) {
    %c2_i32 = arith.constant 2 : i32
    %0 = arith.muli %c2_i32, %arg1 : i32
    %c1_i32 = arith.constant 1 : i32
    %1 = arith.addi %0, %c1_i32 : i32
    %c0_i32 = arith.constant 0 : i32
    %c0_i32_0 = arith.constant 0 : i32
    %c0_i32_1 = arith.constant 0 : i32
    return %arg0, %1, %c0_i32, %c0_i32_0 : i32, i32, i32, i32
  }
  func.func @transform_4(%arg0: i32, %arg1: i32) -> (i32, i32, i32, i32) {
    %c2_i32 = arith.constant 2 : i32
    %0 = arith.muli %c2_i32, %arg1 : i32
    %c2_i32_0 = arith.constant 2 : i32
    %1 = arith.addi %0, %c2_i32_0 : i32
    %c0_i32 = arith.constant 0 : i32
    %c0_i32_1 = arith.constant 0 : i32
    %c0_i32_2 = arith.constant 0 : i32
    return %arg0, %1, %c0_i32, %c0_i32_1 : i32, i32, i32, i32
  }
  func.func @transform_5(%arg0: i32, %arg1: i32) -> (i32, i32, i32, i32) {
    %c2_i32 = arith.constant 2 : i32
    %0 = arith.muli %c2_i32, %arg1 : i32
    %c2_i32_0 = arith.constant 2 : i32
    %1 = arith.addi %0, %c2_i32_0 : i32
    %c0_i32 = arith.constant 0 : i32
    %c0_i32_1 = arith.constant 0 : i32
    %c0_i32_2 = arith.constant 0 : i32
    return %arg0, %1, %c0_i32, %c0_i32_1 : i32, i32, i32, i32
  }
  func.func @transform_6(%arg0: i32, %arg1: i32) -> (i32, i32, i32, i32) {
    %c0_i32 = arith.constant 0 : i32
    %c0_i32_0 = arith.constant 0 : i32
    %c0_i32_1 = arith.constant 0 : i32
    return %arg0, %arg1, %c0_i32, %c0_i32_0 : i32, i32, i32, i32
  }
}

module attributes {stable_mosaic.version = 11 : i64} {
  func.func @_matmul_bn_relu6_kernel(%arg0: i32, %arg1: i32, %arg2: i32, %arg3: memref<128x8xbf16, #tpu.memory_space<vmem>>, %arg4: memref<8x128xbf16, #tpu.memory_space<vmem>>, %arg5: memref<1x128xf32, #tpu.memory_space<vmem>>, %arg6: memref<1x128xf32, #tpu.memory_space<vmem>>, %arg7: memref<128x128xbf16, #tpu.memory_space<vmem>>, %arg8: memref<128x128xf32, #tpu.memory_space<vmem>>) attributes {dimension_semantics = [#tpu.dimension_semantics<parallel>, #tpu.dimension_semantics<parallel>, #tpu.dimension_semantics<arbitrary>], iteration_bounds = array<i64: 4, 1, 1>, scalar_prefetch = 0 : i64, scratch_operands = 1 : i64, tpu.core_type = #tpu.core_type<tc>, window_params = [{transform_indices = @transform_0, window_bounds = array<i64: 128, 8>}, {transform_indices = @transform_1, window_bounds = array<i64: 8, 128>}, {transform_indices = @transform_2, window_bounds = array<i64: 1, 128>}, {transform_indices = @transform_3, window_bounds = array<i64: 1, 128>}, {transform_indices = @transform_4, window_bounds = array<i64: 128, 128>}]} {
    %c0_i32 = arith.constant 0 : i32
    %0 = arith.cmpi eq, %arg2, %c0_i32 : i32
    %1 = arith.extui %0 : i1 to i32
    %c0_i32_0 = arith.constant 0 : i32
    %2 = arith.cmpi ne, %1, %c0_i32_0 : i32
    scf.if %2 {
      %cst_10 = arith.constant 0.000000e+00 : f32
      %12 = vector.broadcast %cst_10 : f32 to vector<128x128xf32>
      %c0_11 = arith.constant 0 : index
      %c0_12 = arith.constant 0 : index
      %13 = vector.load %arg8[%c0_11, %c0_12] : memref<128x128xf32, #tpu.memory_space<vmem>>, vector<128x128xf32>
      tpu.vector_store %arg8[%c0_11, %c0_12], %12 {strides = array<i32>} : memref<128x128xf32, #tpu.memory_space<vmem>>, vector<128x128xf32>,
    } else {
    }
    %c0 = arith.constant 0 : index
    %c0_1 = arith.constant 0 : index
    %3 = vector.load %arg8[%c0, %c0_1] : memref<128x128xf32, #tpu.memory_space<vmem>>, vector<128x128xf32>
    %c0_2 = arith.constant 0 : index
    %c0_3 = arith.constant 0 : index
    %4 = vector.load %arg3[%c0_2, %c0_3] : memref<128x8xbf16, #tpu.memory_space<vmem>>, vector<128x8xbf16>
    %c0_4 = arith.constant 0 : index
    %c0_5 = arith.constant 0 : index
    %5 = vector.load %arg4[%c0_4, %c0_5] : memref<8x128xbf16, #tpu.memory_space<vmem>>, vector<8x128xbf16>
    %cst = arith.constant dense<0.000000e+00> : vector<128x128xf32>
    %6 = tpu.matmul %4, %5, %cst {dimension_numbers = #tpu.dot_dimension_numbers<[1], [0], [0], [1], [0, 0, 1, 1], [], []>} : vector<128x8xbf16>, vector<8x128xbf16>, vector<128x128xf32> -> vector<128x128xf32>
    %7 = arith.addf %3, %6 : vector<128x128xf32>
    %c0_6 = arith.constant 0 : index
    %c0_7 = arith.constant 0 : index
    %8 = vector.load %arg8[%c0_6, %c0_7] : memref<128x128xf32, #tpu.memory_space<vmem>>, vector<128x128xf32>
    tpu.vector_store %arg8[%c0_6, %c0_7], %7 {strides = array<i32>} : memref<128x128xf32, #tpu.memory_space<vmem>>, vector<128x128xf32>,
    %c0_i32_8 = arith.constant 0 : i32
    %9 = arith.cmpi eq, %arg2, %c0_i32_8 : i32
    %10 = arith.extui %9 : i1 to i32
    %c0_i32_9 = arith.constant 0 : i32
    %11 = arith.cmpi ne, %10, %c0_i32_9 : i32
    scf.if %11 {
      %c0_10 = arith.constant 0 : index
      %c0_11 = arith.constant 0 : index
      %12 = vector.load %arg8[%c0_10, %c0_11] : memref<128x128xf32, #tpu.memory_space<vmem>>, vector<128x128xf32>
      %c0_12 = arith.constant 0 : index
      %c0_13 = arith.constant 0 : index
      %13 = vector.load %arg5[%c0_12, %c0_13] : memref<1x128xf32, #tpu.memory_space<vmem>>, vector<1x128xf32>
      %14 = vector.broadcast %13 : vector<1x128xf32> to vector<128x128xf32>
      %15 = arith.mulf %12, %14 : vector<128x128xf32>
      %c0_14 = arith.constant 0 : index
      %c0_15 = arith.constant 0 : index
      %16 = vector.load %arg6[%c0_14, %c0_15] : memref<1x128xf32, #tpu.memory_space<vmem>>, vector<1x128xf32>
      %17 = vector.broadcast %16 : vector<1x128xf32> to vector<128x128xf32>
      %18 = arith.addf %15, %17 : vector<128x128xf32>
      %cst_16 = arith.constant 0.000000e+00 : f32
      %cst_17 = arith.constant 6.000000e+00 : f32
      %19 = vector.broadcast %cst_16 : f32 to vector<128x128xf32>
      %20 = arith.maximumf %19, %18 : vector<128x128xf32>
      %21 = vector.broadcast %cst_17 : f32 to vector<128x128xf32>
      %22 = arith.minimumf %21, %20 : vector<128x128xf32>
      %23 = arith.truncf %22 : vector<128x128xf32> to vector<128x128xbf16>
      %c0_18 = arith.constant 0 : index
      %c0_19 = arith.constant 0 : index
      %24 = vector.load %arg7[%c0_18, %c0_19] : memref<128x128xbf16, #tpu.memory_space<vmem>>, vector<128x128xbf16>
      tpu.vector_store %arg7[%c0_18, %c0_19], %23 {strides = array<i32>} : memref<128x128xbf16, #tpu.memory_space<vmem>>, vector<128x128xbf16>,
    } else {
    }
    return
  }
  func.func @transform_0(%arg0: i32, %arg1: i32, %arg2: i32) -> (i32, i32) {
    %c0_i32 = arith.constant 0 : i32
    return %arg0, %arg2 : i32, i32
  }
  func.func @transform_1(%arg0: i32, %arg1: i32, %arg2: i32) -> (i32, i32) {
    %c0_i32 = arith.constant 0 : i32
    return %arg2, %arg1 : i32, i32
  }
  func.func @transform_2(%arg0: i32, %arg1: i32, %arg2: i32) -> (i32, i32) {
    %c0_i32 = arith.constant 0 : i32
    %c0_i32_0 = arith.constant 0 : i32
    return %c0_i32, %arg1 : i32, i32
  }
  func.func @transform_3(%arg0: i32, %arg1: i32, %arg2: i32) -> (i32, i32) {
    %c0_i32 = arith.constant 0 : i32
    %c0_i32_0 = arith.constant 0 : i32
    return %c0_i32, %arg1 : i32, i32
  }
  func.func @transform_4(%arg0: i32, %arg1: i32, %arg2: i32) -> (i32, i32) {
    %c0_i32 = arith.constant 0 : i32
    return %arg0, %arg1 : i32, i32
  }
}

module attributes {stable_mosaic.version = 11 : i64} {
  func.func @kernel(%arg0: i32, %arg1: i32, %arg2: memref<8x22x8xbf16, #tpu.memory_space<vmem>>, %arg3: memref<56x128xbf16, #tpu.memory_space<vmem>>, %arg4: memref<1x128xf32, #tpu.memory_space<vmem>>, %arg5: memref<1x128xf32, #tpu.memory_space<vmem>>, %arg6: memref<128x128xbf16, #tpu.memory_space<vmem>>) attributes {dimension_semantics = [#tpu.dimension_semantics<parallel>, #tpu.dimension_semantics<parallel>], iteration_bounds = array<i64: 4, 1>, scalar_prefetch = 0 : i64, scratch_operands = 0 : i64, tpu.core_type = #tpu.core_type<tc>, window_params = [{transform_indices = @transform_0, window_bounds = array<i64: 8, 22, 8>}, {transform_indices = @transform_1, window_bounds = array<i64: 56, 128>}, {transform_indices = @transform_2, window_bounds = array<i64: 1, 128>}, {transform_indices = @transform_3, window_bounds = array<i64: 1, 128>}, {transform_indices = @transform_4, window_bounds = array<i64: 128, 128>}]} {
    %c0 = arith.constant 0 : index
    %c0_0 = arith.constant 0 : index
    %c0_1 = arith.constant 0 : index
    %0 = vector.load %arg2[%c0, %c0_0, %c0_1] : memref<8x22x8xbf16, #tpu.memory_space<vmem>>, vector<8x22x8xbf16>
    %1 = vector.extract_strided_slice %0 {offsets = [0, 0, 0], sizes = [1, 16, 8], strides = [1, 1, 1]} : vector<8x22x8xbf16> to vector<1x16x8xbf16>
    %2 = vector.shape_cast %1 : vector<1x16x8xbf16> to vector<16x8xbf16>
    %3 = vector.extract_strided_slice %0 {offsets = [0, 1, 0], sizes = [1, 16, 8], strides = [1, 1, 1]} : vector<8x22x8xbf16> to vector<1x16x8xbf16>
    %4 = vector.shape_cast %3 : vector<1x16x8xbf16> to vector<16x8xbf16>
    %5 = vector.extract_strided_slice %0 {offsets = [0, 2, 0], sizes = [1, 16, 8], strides = [1, 1, 1]} : vector<8x22x8xbf16> to vector<1x16x8xbf16>
    %6 = vector.shape_cast %5 : vector<1x16x8xbf16> to vector<16x8xbf16>
    %7 = vector.extract_strided_slice %0 {offsets = [0, 3, 0], sizes = [1, 16, 8], strides = [1, 1, 1]} : vector<8x22x8xbf16> to vector<1x16x8xbf16>
    %8 = vector.shape_cast %7 : vector<1x16x8xbf16> to vector<16x8xbf16>
    %9 = vector.extract_strided_slice %0 {offsets = [0, 4, 0], sizes = [1, 16, 8], strides = [1, 1, 1]} : vector<8x22x8xbf16> to vector<1x16x8xbf16>
    %10 = vector.shape_cast %9 : vector<1x16x8xbf16> to vector<16x8xbf16>
    %11 = vector.extract_strided_slice %0 {offsets = [0, 5, 0], sizes = [1, 16, 8], strides = [1, 1, 1]} : vector<8x22x8xbf16> to vector<1x16x8xbf16>
    %12 = vector.shape_cast %11 : vector<1x16x8xbf16> to vector<16x8xbf16>
    %13 = vector.extract_strided_slice %0 {offsets = [0, 6, 0], sizes = [1, 16, 8], strides = [1, 1, 1]} : vector<8x22x8xbf16> to vector<1x16x8xbf16>
    %14 = vector.shape_cast %13 : vector<1x16x8xbf16> to vector<16x8xbf16>
    %15 = tpu.concatenate %2, %4, %6, %8, %10, %12, %14 in 1 : vector<16x8xbf16>, vector<16x8xbf16>, vector<16x8xbf16>, vector<16x8xbf16>, vector<16x8xbf16>, vector<16x8xbf16>, vector<16x8xbf16> -> vector<16x56xbf16>
    %16 = vector.extract_strided_slice %0 {offsets = [1, 0, 0], sizes = [1, 16, 8], strides = [1, 1, 1]} : vector<8x22x8xbf16> to vector<1x16x8xbf16>
    %17 = vector.shape_cast %16 : vector<1x16x8xbf16> to vector<16x8xbf16>
    %18 = vector.extract_strided_slice %0 {offsets = [1, 1, 0], sizes = [1, 16, 8], strides = [1, 1, 1]} : vector<8x22x8xbf16> to vector<1x16x8xbf16>
    %19 = vector.shape_cast %18 : vector<1x16x8xbf16> to vector<16x8xbf16>
    %20 = vector.extract_strided_slice %0 {offsets = [1, 2, 0], sizes = [1, 16, 8], strides = [1, 1, 1]} : vector<8x22x8xbf16> to vector<1x16x8xbf16>
    %21 = vector.shape_cast %20 : vector<1x16x8xbf16> to vector<16x8xbf16>
    %22 = vector.extract_strided_slice %0 {offsets = [1, 3, 0], sizes = [1, 16, 8], strides = [1, 1, 1]} : vector<8x22x8xbf16> to vector<1x16x8xbf16>
    %23 = vector.shape_cast %22 : vector<1x16x8xbf16> to vector<16x8xbf16>
    %24 = vector.extract_strided_slice %0 {offsets = [1, 4, 0], sizes = [1, 16, 8], strides = [1, 1, 1]} : vector<8x22x8xbf16> to vector<1x16x8xbf16>
    %25 = vector.shape_cast %24 : vector<1x16x8xbf16> to vector<16x8xbf16>
    %26 = vector.extract_strided_slice %0 {offsets = [1, 5, 0], sizes = [1, 16, 8], strides = [1, 1, 1]} : vector<8x22x8xbf16> to vector<1x16x8xbf16>
    %27 = vector.shape_cast %26 : vector<1x16x8xbf16> to vector<16x8xbf16>
    %28 = vector.extract_strided_slice %0 {offsets = [1, 6, 0], sizes = [1, 16, 8], strides = [1, 1, 1]} : vector<8x22x8xbf16> to vector<1x16x8xbf16>
    %29 = vector.shape_cast %28 : vector<1x16x8xbf16> to vector<16x8xbf16>
    %30 = tpu.concatenate %17, %19, %21, %23, %25, %27, %29 in 1 : vector<16x8xbf16>, vector<16x8xbf16>, vector<16x8xbf16>, vector<16x8xbf16>, vector<16x8xbf16>, vector<16x8xbf16>, vector<16x8xbf16> -> vector<16x56xbf16>
    %31 = vector.extract_strided_slice %0 {offsets = [2, 0, 0], sizes = [1, 16, 8], strides = [1, 1, 1]} : vector<8x22x8xbf16> to vector<1x16x8xbf16>
    %32 = vector.shape_cast %31 : vector<1x16x8xbf16> to vector<16x8xbf16>
    %33 = vector.extract_strided_slice %0 {offsets = [2, 1, 0], sizes = [1, 16, 8], strides = [1, 1, 1]} : vector<8x22x8xbf16> to vector<1x16x8xbf16>
    %34 = vector.shape_cast %33 : vector<1x16x8xbf16> to vector<16x8xbf16>
    %35 = vector.extract_strided_slice %0 {offsets = [2, 2, 0], sizes = [1, 16, 8], strides = [1, 1, 1]} : vector<8x22x8xbf16> to vector<1x16x8xbf16>
    %36 = vector.shape_cast %35 : vector<1x16x8xbf16> to vector<16x8xbf16>
    %37 = vector.extract_strided_slice %0 {offsets = [2, 3, 0], sizes = [1, 16, 8], strides = [1, 1, 1]} : vector<8x22x8xbf16> to vector<1x16x8xbf16>
    %38 = vector.shape_cast %37 : vector<1x16x8xbf16> to vector<16x8xbf16>
    %39 = vector.extract_strided_slice %0 {offsets = [2, 4, 0], sizes = [1, 16, 8], strides = [1, 1, 1]} : vector<8x22x8xbf16> to vector<1x16x8xbf16>
    %40 = vector.shape_cast %39 : vector<1x16x8xbf16> to vector<16x8xbf16>
    %41 = vector.extract_strided_slice %0 {offsets = [2, 5, 0], sizes = [1, 16, 8], strides = [1, 1, 1]} : vector<8x22x8xbf16> to vector<1x16x8xbf16>
    %42 = vector.shape_cast %41 : vector<1x16x8xbf16> to vector<16x8xbf16>
    %43 = vector.extract_strided_slice %0 {offsets = [2, 6, 0], sizes = [1, 16, 8], strides = [1, 1, 1]} : vector<8x22x8xbf16> to vector<1x16x8xbf16>
    %44 = vector.shape_cast %43 : vector<1x16x8xbf16> to vector<16x8xbf16>
    %45 = tpu.concatenate %32, %34, %36, %38, %40, %42, %44 in 1 : vector<16x8xbf16>, vector<16x8xbf16>, vector<16x8xbf16>, vector<16x8xbf16>, vector<16x8xbf16>, vector<16x8xbf16>, vector<16x8xbf16> -> vector<16x56xbf16>
    %46 = vector.extract_strided_slice %0 {offsets = [3, 0, 0], sizes = [1, 16, 8], strides = [1, 1, 1]} : vector<8x22x8xbf16> to vector<1x16x8xbf16>
    %47 = vector.shape_cast %46 : vector<1x16x8xbf16> to vector<16x8xbf16>
    %48 = vector.extract_strided_slice %0 {offsets = [3, 1, 0], sizes = [1, 16, 8], strides = [1, 1, 1]} : vector<8x22x8xbf16> to vector<1x16x8xbf16>
    %49 = vector.shape_cast %48 : vector<1x16x8xbf16> to vector<16x8xbf16>
    %50 = vector.extract_strided_slice %0 {offsets = [3, 2, 0], sizes = [1, 16, 8], strides = [1, 1, 1]} : vector<8x22x8xbf16> to vector<1x16x8xbf16>
    %51 = vector.shape_cast %50 : vector<1x16x8xbf16> to vector<16x8xbf16>
    %52 = vector.extract_strided_slice %0 {offsets = [3, 3, 0], sizes = [1, 16, 8], strides = [1, 1, 1]} : vector<8x22x8xbf16> to vector<1x16x8xbf16>
    %53 = vector.shape_cast %52 : vector<1x16x8xbf16> to vector<16x8xbf16>
    %54 = vector.extract_strided_slice %0 {offsets = [3, 4, 0], sizes = [1, 16, 8], strides = [1, 1, 1]} : vector<8x22x8xbf16> to vector<1x16x8xbf16>
    %55 = vector.shape_cast %54 : vector<1x16x8xbf16> to vector<16x8xbf16>
    %56 = vector.extract_strided_slice %0 {offsets = [3, 5, 0], sizes = [1, 16, 8], strides = [1, 1, 1]} : vector<8x22x8xbf16> to vector<1x16x8xbf16>
    %57 = vector.shape_cast %56 : vector<1x16x8xbf16> to vector<16x8xbf16>
    %58 = vector.extract_strided_slice %0 {offsets = [3, 6, 0], sizes = [1, 16, 8], strides = [1, 1, 1]} : vector<8x22x8xbf16> to vector<1x16x8xbf16>
    %59 = vector.shape_cast %58 : vector<1x16x8xbf16> to vector<16x8xbf16>
    %60 = tpu.concatenate %47, %49, %51, %53, %55, %57, %59 in 1 : vector<16x8xbf16>, vector<16x8xbf16>, vector<16x8xbf16>, vector<16x8xbf16>, vector<16x8xbf16>, vector<16x8xbf16>, vector<16x8xbf16> -> vector<16x56xbf16>
    %61 = vector.extract_strided_slice %0 {offsets = [4, 0, 0], sizes = [1, 16, 8], strides = [1, 1, 1]} : vector<8x22x8xbf16> to vector<1x16x8xbf16>
    %62 = vector.shape_cast %61 : vector<1x16x8xbf16> to vector<16x8xbf16>
    %63 = vector.extract_strided_slice %0 {offsets = [4, 1, 0], sizes = [1, 16, 8], strides = [1, 1, 1]} : vector<8x22x8xbf16> to vector<1x16x8xbf16>
    %64 = vector.shape_cast %63 : vector<1x16x8xbf16> to vector<16x8xbf16>
    %65 = vector.extract_strided_slice %0 {offsets = [4, 2, 0], sizes = [1, 16, 8], strides = [1, 1, 1]} : vector<8x22x8xbf16> to vector<1x16x8xbf16>
    %66 = vector.shape_cast %65 : vector<1x16x8xbf16> to vector<16x8xbf16>
    %67 = vector.extract_strided_slice %0 {offsets = [4, 3, 0], sizes = [1, 16, 8], strides = [1, 1, 1]} : vector<8x22x8xbf16> to vector<1x16x8xbf16>
    %68 = vector.shape_cast %67 : vector<1x16x8xbf16> to vector<16x8xbf16>
    %69 = vector.extract_strided_slice %0 {offsets = [4, 4, 0], sizes = [1, 16, 8], strides = [1, 1, 1]} : vector<8x22x8xbf16> to vector<1x16x8xbf16>
    %70 = vector.shape_cast %69 : vector<1x16x8xbf16> to vector<16x8xbf16>
    %71 = vector.extract_strided_slice %0 {offsets = [4, 5, 0], sizes = [1, 16, 8], strides = [1, 1, 1]} : vector<8x22x8xbf16> to vector<1x16x8xbf16>
    %72 = vector.shape_cast %71 : vector<1x16x8xbf16> to vector<16x8xbf16>
    %73 = vector.extract_strided_slice %0 {offsets = [4, 6, 0], sizes = [1, 16, 8], strides = [1, 1, 1]} : vector<8x22x8xbf16> to vector<1x16x8xbf16>
    %74 = vector.shape_cast %73 : vector<1x16x8xbf16> to vector<16x8xbf16>
    %75 = tpu.concatenate %62, %64, %66, %68, %70, %72, %74 in 1 : vector<16x8xbf16>, vector<16x8xbf16>, vector<16x8xbf16>, vector<16x8xbf16>, vector<16x8xbf16>, vector<16x8xbf16>, vector<16x8xbf16> -> vector<16x56xbf16>
    %76 = vector.extract_strided_slice %0 {offsets = [5, 0, 0], sizes = [1, 16, 8], strides = [1, 1, 1]} : vector<8x22x8xbf16> to vector<1x16x8xbf16>
    %77 = vector.shape_cast %76 : vector<1x16x8xbf16> to vector<16x8xbf16>
    %78 = vector.extract_strided_slice %0 {offsets = [5, 1, 0], sizes = [1, 16, 8], strides = [1, 1, 1]} : vector<8x22x8xbf16> to vector<1x16x8xbf16>
    %79 = vector.shape_cast %78 : vector<1x16x8xbf16> to vector<16x8xbf16>
    %80 = vector.extract_strided_slice %0 {offsets = [5, 2, 0], sizes = [1, 16, 8], strides = [1, 1, 1]} : vector<8x22x8xbf16> to vector<1x16x8xbf16>
    %81 = vector.shape_cast %80 : vector<1x16x8xbf16> to vector<16x8xbf16>
    %82 = vector.extract_strided_slice %0 {offsets = [5, 3, 0], sizes = [1, 16, 8], strides = [1, 1, 1]} : vector<8x22x8xbf16> to vector<1x16x8xbf16>
    %83 = vector.shape_cast %82 : vector<1x16x8xbf16> to vector<16x8xbf16>
    %84 = vector.extract_strided_slice %0 {offsets = [5, 4, 0], sizes = [1, 16, 8], strides = [1, 1, 1]} : vector<8x22x8xbf16> to vector<1x16x8xbf16>
    %85 = vector.shape_cast %84 : vector<1x16x8xbf16> to vector<16x8xbf16>
    %86 = vector.extract_strided_slice %0 {offsets = [5, 5, 0], sizes = [1, 16, 8], strides = [1, 1, 1]} : vector<8x22x8xbf16> to vector<1x16x8xbf16>
    %87 = vector.shape_cast %86 : vector<1x16x8xbf16> to vector<16x8xbf16>
    %88 = vector.extract_strided_slice %0 {offsets = [5, 6, 0], sizes = [1, 16, 8], strides = [1, 1, 1]} : vector<8x22x8xbf16> to vector<1x16x8xbf16>
    %89 = vector.shape_cast %88 : vector<1x16x8xbf16> to vector<16x8xbf16>
    %90 = tpu.concatenate %77, %79, %81, %83, %85, %87, %89 in 1 : vector<16x8xbf16>, vector<16x8xbf16>, vector<16x8xbf16>, vector<16x8xbf16>, vector<16x8xbf16>, vector<16x8xbf16>, vector<16x8xbf16> -> vector<16x56xbf16>
    %91 = vector.extract_strided_slice %0 {offsets = [6, 0, 0], sizes = [1, 16, 8], strides = [1, 1, 1]} : vector<8x22x8xbf16> to vector<1x16x8xbf16>
    %92 = vector.shape_cast %91 : vector<1x16x8xbf16> to vector<16x8xbf16>
    %93 = vector.extract_strided_slice %0 {offsets = [6, 1, 0], sizes = [1, 16, 8], strides = [1, 1, 1]} : vector<8x22x8xbf16> to vector<1x16x8xbf16>
    %94 = vector.shape_cast %93 : vector<1x16x8xbf16> to vector<16x8xbf16>
    %95 = vector.extract_strided_slice %0 {offsets = [6, 2, 0], sizes = [1, 16, 8], strides = [1, 1, 1]} : vector<8x22x8xbf16> to vector<1x16x8xbf16>
    %96 = vector.shape_cast %95 : vector<1x16x8xbf16> to vector<16x8xbf16>
    %97 = vector.extract_strided_slice %0 {offsets = [6, 3, 0], sizes = [1, 16, 8], strides = [1, 1, 1]} : vector<8x22x8xbf16> to vector<1x16x8xbf16>
    %98 = vector.shape_cast %97 : vector<1x16x8xbf16> to vector<16x8xbf16>
    %99 = vector.extract_strided_slice %0 {offsets = [6, 4, 0], sizes = [1, 16, 8], strides = [1, 1, 1]} : vector<8x22x8xbf16> to vector<1x16x8xbf16>
    %100 = vector.shape_cast %99 : vector<1x16x8xbf16> to vector<16x8xbf16>
    %101 = vector.extract_strided_slice %0 {offsets = [6, 5, 0], sizes = [1, 16, 8], strides = [1, 1, 1]} : vector<8x22x8xbf16> to vector<1x16x8xbf16>
    %102 = vector.shape_cast %101 : vector<1x16x8xbf16> to vector<16x8xbf16>
    %103 = vector.extract_strided_slice %0 {offsets = [6, 6, 0], sizes = [1, 16, 8], strides = [1, 1, 1]} : vector<8x22x8xbf16> to vector<1x16x8xbf16>
    %104 = vector.shape_cast %103 : vector<1x16x8xbf16> to vector<16x8xbf16>
    %105 = tpu.concatenate %92, %94, %96, %98, %100, %102, %104 in 1 : vector<16x8xbf16>, vector<16x8xbf16>, vector<16x8xbf16>, vector<16x8xbf16>, vector<16x8xbf16>, vector<16x8xbf16>, vector<16x8xbf16> -> vector<16x56xbf16>
    %106 = vector.extract_strided_slice %0 {offsets = [7, 0, 0], sizes = [1, 16, 8], strides = [1, 1, 1]} : vector<8x22x8xbf16> to vector<1x16x8xbf16>
    %107 = vector.shape_cast %106 : vector<1x16x8xbf16> to vector<16x8xbf16>
    %108 = vector.extract_strided_slice %0 {offsets = [7, 1, 0], sizes = [1, 16, 8], strides = [1, 1, 1]} : vector<8x22x8xbf16> to vector<1x16x8xbf16>
    %109 = vector.shape_cast %108 : vector<1x16x8xbf16> to vector<16x8xbf16>
    %110 = vector.extract_strided_slice %0 {offsets = [7, 2, 0], sizes = [1, 16, 8], strides = [1, 1, 1]} : vector<8x22x8xbf16> to vector<1x16x8xbf16>
    %111 = vector.shape_cast %110 : vector<1x16x8xbf16> to vector<16x8xbf16>
    %112 = vector.extract_strided_slice %0 {offsets = [7, 3, 0], sizes = [1, 16, 8], strides = [1, 1, 1]} : vector<8x22x8xbf16> to vector<1x16x8xbf16>
    %113 = vector.shape_cast %112 : vector<1x16x8xbf16> to vector<16x8xbf16>
    %114 = vector.extract_strided_slice %0 {offsets = [7, 4, 0], sizes = [1, 16, 8], strides = [1, 1, 1]} : vector<8x22x8xbf16> to vector<1x16x8xbf16>
    %115 = vector.shape_cast %114 : vector<1x16x8xbf16> to vector<16x8xbf16>
    %116 = vector.extract_strided_slice %0 {offsets = [7, 5, 0], sizes = [1, 16, 8], strides = [1, 1, 1]} : vector<8x22x8xbf16> to vector<1x16x8xbf16>
    %117 = vector.shape_cast %116 : vector<1x16x8xbf16> to vector<16x8xbf16>
    %118 = vector.extract_strided_slice %0 {offsets = [7, 6, 0], sizes = [1, 16, 8], strides = [1, 1, 1]} : vector<8x22x8xbf16> to vector<1x16x8xbf16>
    %119 = vector.shape_cast %118 : vector<1x16x8xbf16> to vector<16x8xbf16>
    %120 = tpu.concatenate %107, %109, %111, %113, %115, %117, %119 in 1 : vector<16x8xbf16>, vector<16x8xbf16>, vector<16x8xbf16>, vector<16x8xbf16>, vector<16x8xbf16>, vector<16x8xbf16>, vector<16x8xbf16> -> vector<16x56xbf16>
    %121 = tpu.concatenate %15, %30, %45, %60, %75, %90, %105, %120 in 0 : vector<16x56xbf16>, vector<16x56xbf16>, vector<16x56xbf16>, vector<16x56xbf16>, vector<16x56xbf16>, vector<16x56xbf16>, vector<16x56xbf16>, vector<16x56xbf16> -> vector<128x56xbf16>
    %c0_2 = arith.constant 0 : index
    %c0_3 = arith.constant 0 : index
    %122 = vector.load %arg3[%c0_2, %c0_3] : memref<56x128xbf16, #tpu.memory_space<vmem>>, vector<56x128xbf16>
    %cst = arith.constant dense<0.000000e+00> : vector<128x128xf32>
    %123 = tpu.matmul %121, %122, %cst {dimension_numbers = #tpu.dot_dimension_numbers<[1], [0], [0], [1], [0, 0, 1, 1], [], []>} : vector<128x56xbf16>, vector<56x128xbf16>, vector<128x128xf32> -> vector<128x128xf32>
    %c0_4 = arith.constant 0 : index
    %c0_5 = arith.constant 0 : index
    %124 = vector.load %arg4[%c0_4, %c0_5] : memref<1x128xf32, #tpu.memory_space<vmem>>, vector<1x128xf32>
    %125 = vector.broadcast %124 : vector<1x128xf32> to vector<128x128xf32>
    %126 = arith.mulf %123, %125 : vector<128x128xf32>
    %c0_6 = arith.constant 0 : index
    %c0_7 = arith.constant 0 : index
    %127 = vector.load %arg5[%c0_6, %c0_7] : memref<1x128xf32, #tpu.memory_space<vmem>>, vector<1x128xf32>
    %128 = vector.broadcast %127 : vector<1x128xf32> to vector<128x128xf32>
    %129 = arith.addf %126, %128 : vector<128x128xf32>
    %cst_8 = arith.constant 0.000000e+00 : f32
    %cst_9 = arith.constant 6.000000e+00 : f32
    %130 = vector.broadcast %cst_8 : f32 to vector<128x128xf32>
    %131 = arith.maximumf %130, %129 : vector<128x128xf32>
    %132 = vector.broadcast %cst_9 : f32 to vector<128x128xf32>
    %133 = arith.minimumf %132, %131 : vector<128x128xf32>
    %134 = arith.truncf %133 : vector<128x128xf32> to vector<128x128xbf16>
    %c0_10 = arith.constant 0 : index
    %c0_11 = arith.constant 0 : index
    %135 = vector.load %arg6[%c0_10, %c0_11] : memref<128x128xbf16, #tpu.memory_space<vmem>>, vector<128x128xbf16>
    tpu.vector_store %arg6[%c0_10, %c0_11], %134 {strides = array<i32>} : memref<128x128xbf16, #tpu.memory_space<vmem>>, vector<128x128xbf16>,
    return
  }
  func.func @transform_0(%arg0: i32, %arg1: i32) -> (i32, i32, i32) {
    %c0_i32 = arith.constant 0 : i32
    %c0_i32_0 = arith.constant 0 : i32
    %c0_i32_1 = arith.constant 0 : i32
    return %arg0, %c0_i32, %c0_i32_0 : i32, i32, i32
  }
  func.func @transform_1(%arg0: i32, %arg1: i32) -> (i32, i32) {
    %c0_i32 = arith.constant 0 : i32
    %c0_i32_0 = arith.constant 0 : i32
    return %c0_i32, %arg1 : i32, i32
  }
  func.func @transform_2(%arg0: i32, %arg1: i32) -> (i32, i32) {
    %c0_i32 = arith.constant 0 : i32
    %c0_i32_0 = arith.constant 0 : i32
    return %c0_i32, %arg1 : i32, i32
  }
  func.func @transform_3(%arg0: i32, %arg1: i32) -> (i32, i32) {
    %c0_i32 = arith.constant 0 : i32
    %c0_i32_0 = arith.constant 0 : i32
    return %c0_i32, %arg1 : i32, i32
  }
  func.func @transform_4(%arg0: i32, %arg1: i32) -> (i32, i32) {
    %c0_i32 = arith.constant 0 : i32
    return %arg0, %arg1 : i32, i32
  }
}

module attributes {stable_mosaic.version = 11 : i64} {
  func.func @kernel(%arg0: i32, %arg1: i32, %arg2: i32, %arg3: memref<1x1x8x8xbf16, #tpu.memory_space<vmem>>, %arg4: memref<1x1x8x8xbf16, #tpu.memory_space<vmem>>, %arg5: memref<1x1x8x8xbf16, #tpu.memory_space<vmem>>, %arg6: memref<1x1x8x8xbf16, #tpu.memory_space<vmem>>, %arg7: memref<1x1x8x8xbf16, #tpu.memory_space<vmem>>, %arg8: memref<1x1x8x8xbf16, #tpu.memory_space<vmem>>, %arg9: memref<72x128xbf16, #tpu.memory_space<vmem>>, %arg10: memref<1x128xf32, #tpu.memory_space<vmem>>, %arg11: memref<1x128xf32, #tpu.memory_space<vmem>>, %arg12: memref<1x1x7x128xf32, #tpu.memory_space<vmem>>) attributes {dimension_semantics = [#tpu.dimension_semantics<parallel>, #tpu.dimension_semantics<parallel>, #tpu.dimension_semantics<parallel>], iteration_bounds = array<i64: 2, 7, 1>, scalar_prefetch = 0 : i64, scratch_operands = 0 : i64, tpu.core_type = #tpu.core_type<tc>, window_params = [{transform_indices = @transform_0, window_bounds = array<i64: 1, 1, 8, 8>}, {transform_indices = @transform_1, window_bounds = array<i64: 1, 1, 8, 8>}, {transform_indices = @transform_2, window_bounds = array<i64: 1, 1, 8, 8>}, {transform_indices = @transform_3, window_bounds = array<i64: 1, 1, 8, 8>}, {transform_indices = @transform_4, window_bounds = array<i64: 1, 1, 8, 8>}, {transform_indices = @transform_5, window_bounds = array<i64: 1, 1, 8, 8>}, {transform_indices = @transform_6, window_bounds = array<i64: 72, 128>}, {transform_indices = @transform_7, window_bounds = array<i64: 1, 128>}, {transform_indices = @transform_8, window_bounds = array<i64: 1, 128>}, {transform_indices = @transform_9, window_bounds = array<i64: 1, 1, 7, 128>}]} {
    %c0 = arith.constant 0 : index
    %c0_0 = arith.constant 0 : index
    %c0_1 = arith.constant 0 : index
    %c0_2 = arith.constant 0 : index
    %0 = vector.load %arg3[%c0, %c0_0, %c0_1, %c0_2] : memref<1x1x8x8xbf16, #tpu.memory_space<vmem>>, vector<1x1x8x8xbf16>
    %1 = vector.shape_cast %0 : vector<1x1x8x8xbf16> to vector<8x8xbf16>
    %2 = vector.extract_strided_slice %1 {offsets = [0, 0], sizes = [7, 8], strides = [1, 1]} : vector<8x8xbf16> to vector<7x8xbf16>
    %c0_3 = arith.constant 0 : index
    %c0_4 = arith.constant 0 : index
    %c0_5 = arith.constant 0 : index
    %c0_6 = arith.constant 0 : index
    %3 = vector.load %arg4[%c0_3, %c0_4, %c0_5, %c0_6] : memref<1x1x8x8xbf16, #tpu.memory_space<vmem>>, vector<1x1x8x8xbf16>
    %4 = vector.shape_cast %3 : vector<1x1x8x8xbf16> to vector<8x8xbf16>
    %5 = vector.extract_strided_slice %4 {offsets = [0, 0], sizes = [7, 8], strides = [1, 1]} : vector<8x8xbf16> to vector<7x8xbf16>
    %c0_7 = arith.constant 0 : index
    %c0_8 = arith.constant 0 : index
    %c0_9 = arith.constant 0 : index
    %c0_10 = arith.constant 0 : index
    %6 = vector.load %arg3[%c0_7, %c0_8, %c0_9, %c0_10] : memref<1x1x8x8xbf16, #tpu.memory_space<vmem>>, vector<1x1x8x8xbf16>
    %7 = vector.shape_cast %6 : vector<1x1x8x8xbf16> to vector<8x8xbf16>
    %8 = vector.extract_strided_slice %7 {offsets = [1, 0], sizes = [7, 8], strides = [1, 1]} : vector<8x8xbf16> to vector<7x8xbf16>
    %c0_11 = arith.constant 0 : index
    %c0_12 = arith.constant 0 : index
    %c0_13 = arith.constant 0 : index
    %c0_14 = arith.constant 0 : index
    %9 = vector.load %arg5[%c0_11, %c0_12, %c0_13, %c0_14] : memref<1x1x8x8xbf16, #tpu.memory_space<vmem>>, vector<1x1x8x8xbf16>
    %10 = vector.shape_cast %9 : vector<1x1x8x8xbf16> to vector<8x8xbf16>
    %11 = vector.extract_strided_slice %10 {offsets = [0, 0], sizes = [7, 8], strides = [1, 1]} : vector<8x8xbf16> to vector<7x8xbf16>
    %c0_15 = arith.constant 0 : index
    %c0_16 = arith.constant 0 : index
    %c0_17 = arith.constant 0 : index
    %c0_18 = arith.constant 0 : index
    %12 = vector.load %arg6[%c0_15, %c0_16, %c0_17, %c0_18] : memref<1x1x8x8xbf16, #tpu.memory_space<vmem>>, vector<1x1x8x8xbf16>
    %13 = vector.shape_cast %12 : vector<1x1x8x8xbf16> to vector<8x8xbf16>
    %14 = vector.extract_strided_slice %13 {offsets = [0, 0], sizes = [7, 8], strides = [1, 1]} : vector<8x8xbf16> to vector<7x8xbf16>
    %c0_19 = arith.constant 0 : index
    %c0_20 = arith.constant 0 : index
    %c0_21 = arith.constant 0 : index
    %c0_22 = arith.constant 0 : index
    %15 = vector.load %arg5[%c0_19, %c0_20, %c0_21, %c0_22] : memref<1x1x8x8xbf16, #tpu.memory_space<vmem>>, vector<1x1x8x8xbf16>
    %16 = vector.shape_cast %15 : vector<1x1x8x8xbf16> to vector<8x8xbf16>
    %17 = vector.extract_strided_slice %16 {offsets = [1, 0], sizes = [7, 8], strides = [1, 1]} : vector<8x8xbf16> to vector<7x8xbf16>
    %c0_23 = arith.constant 0 : index
    %c0_24 = arith.constant 0 : index
    %c0_25 = arith.constant 0 : index
    %c0_26 = arith.constant 0 : index
    %18 = vector.load %arg7[%c0_23, %c0_24, %c0_25, %c0_26] : memref<1x1x8x8xbf16, #tpu.memory_space<vmem>>, vector<1x1x8x8xbf16>
    %19 = vector.shape_cast %18 : vector<1x1x8x8xbf16> to vector<8x8xbf16>
    %20 = vector.extract_strided_slice %19 {offsets = [0, 0], sizes = [7, 8], strides = [1, 1]} : vector<8x8xbf16> to vector<7x8xbf16>
    %c0_27 = arith.constant 0 : index
    %c0_28 = arith.constant 0 : index
    %c0_29 = arith.constant 0 : index
    %c0_30 = arith.constant 0 : index
    %21 = vector.load %arg8[%c0_27, %c0_28, %c0_29, %c0_30] : memref<1x1x8x8xbf16, #tpu.memory_space<vmem>>, vector<1x1x8x8xbf16>
    %22 = vector.shape_cast %21 : vector<1x1x8x8xbf16> to vector<8x8xbf16>
    %23 = vector.extract_strided_slice %22 {offsets = [0, 0], sizes = [7, 8], strides = [1, 1]} : vector<8x8xbf16> to vector<7x8xbf16>
    %c0_31 = arith.constant 0 : index
    %c0_32 = arith.constant 0 : index
    %c0_33 = arith.constant 0 : index
    %c0_34 = arith.constant 0 : index
    %24 = vector.load %arg7[%c0_31, %c0_32, %c0_33, %c0_34] : memref<1x1x8x8xbf16, #tpu.memory_space<vmem>>, vector<1x1x8x8xbf16>
    %25 = vector.shape_cast %24 : vector<1x1x8x8xbf16> to vector<8x8xbf16>
    %26 = vector.extract_strided_slice %25 {offsets = [1, 0], sizes = [7, 8], strides = [1, 1]} : vector<8x8xbf16> to vector<7x8xbf16>
    %27 = tpu.concatenate %2, %5, %8, %11, %14, %17, %20, %23, %26 in 1 : vector<7x8xbf16>, vector<7x8xbf16>, vector<7x8xbf16>, vector<7x8xbf16>, vector<7x8xbf16>, vector<7x8xbf16>, vector<7x8xbf16>, vector<7x8xbf16>, vector<7x8xbf16> -> vector<7x72xbf16>
    %c0_35 = arith.constant 0 : index
    %c0_36 = arith.constant 0 : index
    %28 = vector.load %arg9[%c0_35, %c0_36] : memref<72x128xbf16, #tpu.memory_space<vmem>>, vector<72x128xbf16>
    %cst = arith.constant dense<0.000000e+00> : vector<7x128xf32>
    %29 = tpu.matmul %27, %28, %cst {dimension_numbers = #tpu.dot_dimension_numbers<[1], [0], [0], [1], [0, 0, 1, 1], [], []>} : vector<7x72xbf16>, vector<72x128xbf16>, vector<7x128xf32> -> vector<7x128xf32>
    %c0_37 = arith.constant 0 : index
    %c0_38 = arith.constant 0 : index
    %30 = vector.load %arg10[%c0_37, %c0_38] : memref<1x128xf32, #tpu.memory_space<vmem>>, vector<1x128xf32>
    %31 = vector.broadcast %30 : vector<1x128xf32> to vector<7x128xf32>
    %32 = arith.mulf %29, %31 : vector<7x128xf32>
    %c0_39 = arith.constant 0 : index
    %c0_40 = arith.constant 0 : index
    %33 = vector.load %arg11[%c0_39, %c0_40] : memref<1x128xf32, #tpu.memory_space<vmem>>, vector<1x128xf32>
    %34 = vector.broadcast %33 : vector<1x128xf32> to vector<7x128xf32>
    %35 = arith.addf %32, %34 : vector<7x128xf32>
    %cst_41 = arith.constant 0.000000e+00 : f32
    %cst_42 = arith.constant 6.000000e+00 : f32
    %36 = vector.broadcast %cst_41 : f32 to vector<7x128xf32>
    %37 = arith.maximumf %36, %35 : vector<7x128xf32>
    %38 = vector.broadcast %cst_42 : f32 to vector<7x128xf32>
    %39 = arith.minimumf %38, %37 : vector<7x128xf32>
    %c0_43 = arith.constant 0 : index
    %c0_44 = arith.constant 0 : index
    %c0_45 = arith.constant 0 : index
    %c0_46 = arith.constant 0 : index
    %40 = vector.load %arg12[%c0_43, %c0_44, %c0_45, %c0_46] : memref<1x1x7x128xf32, #tpu.memory_space<vmem>>, vector<1x1x7x128xf32>
    %41 = vector.shape_cast %40 : vector<1x1x7x128xf32> to vector<7x128xf32>
    %42 = vector.shape_cast %39 : vector<7x128xf32> to vector<1x1x7x128xf32>
    tpu.vector_store %arg12[%c0_43, %c0_44, %c0_45, %c0_46], %42 {strides = array<i32>} : memref<1x1x7x128xf32, #tpu.memory_space<vmem>>, vector<1x1x7x128xf32>,
    return
  }
  func.func @transform_0(%arg0: i32, %arg1: i32, %arg2: i32) -> (i32, i32, i32, i32) {
    %c2_i32 = arith.constant 2 : i32
    %0 = arith.muli %c2_i32, %arg1 : i32
    %c0_i32 = arith.constant 0 : i32
    %1 = arith.addi %0, %c0_i32 : i32
    %c0_i32_0 = arith.constant 0 : i32
    %c0_i32_1 = arith.constant 0 : i32
    %c0_i32_2 = arith.constant 0 : i32
    return %arg0, %1, %c0_i32_0, %c0_i32_1 : i32, i32, i32, i32
  }
  func.func @transform_1(%arg0: i32, %arg1: i32, %arg2: i32) -> (i32, i32, i32, i32) {
    %c2_i32 = arith.constant 2 : i32
    %0 = arith.muli %c2_i32, %arg1 : i32
    %c0_i32 = arith.constant 0 : i32
    %1 = arith.addi %0, %c0_i32 : i32
    %c0_i32_0 = arith.constant 0 : i32
    %c0_i32_1 = arith.constant 0 : i32
    %c0_i32_2 = arith.constant 0 : i32
    return %arg0, %1, %c0_i32_0, %c0_i32_1 : i32, i32, i32, i32
  }
  func.func @transform_2(%arg0: i32, %arg1: i32, %arg2: i32) -> (i32, i32, i32, i32) {
    %c2_i32 = arith.constant 2 : i32
    %0 = arith.muli %c2_i32, %arg1 : i32
    %c1_i32 = arith.constant 1 : i32
    %1 = arith.addi %0, %c1_i32 : i32
    %c0_i32 = arith.constant 0 : i32
    %c0_i32_0 = arith.constant 0 : i32
    %c0_i32_1 = arith.constant 0 : i32
    return %arg0, %1, %c0_i32, %c0_i32_0 : i32, i32, i32, i32
  }
  func.func @transform_3(%arg0: i32, %arg1: i32, %arg2: i32) -> (i32, i32, i32, i32) {
    %c2_i32 = arith.constant 2 : i32
    %0 = arith.muli %c2_i32, %arg1 : i32
    %c1_i32 = arith.constant 1 : i32
    %1 = arith.addi %0, %c1_i32 : i32
    %c0_i32 = arith.constant 0 : i32
    %c0_i32_0 = arith.constant 0 : i32
    %c0_i32_1 = arith.constant 0 : i32
    return %arg0, %1, %c0_i32, %c0_i32_0 : i32, i32, i32, i32
  }
  func.func @transform_4(%arg0: i32, %arg1: i32, %arg2: i32) -> (i32, i32, i32, i32) {
    %c2_i32 = arith.constant 2 : i32
    %0 = arith.muli %c2_i32, %arg1 : i32
    %c2_i32_0 = arith.constant 2 : i32
    %1 = arith.addi %0, %c2_i32_0 : i32
    %c0_i32 = arith.constant 0 : i32
    %c0_i32_1 = arith.constant 0 : i32
    %c0_i32_2 = arith.constant 0 : i32
    return %arg0, %1, %c0_i32, %c0_i32_1 : i32, i32, i32, i32
  }
  func.func @transform_5(%arg0: i32, %arg1: i32, %arg2: i32) -> (i32, i32, i32, i32) {
    %c2_i32 = arith.constant 2 : i32
    %0 = arith.muli %c2_i32, %arg1 : i32
    %c2_i32_0 = arith.constant 2 : i32
    %1 = arith.addi %0, %c2_i32_0 : i32
    %c0_i32 = arith.constant 0 : i32
    %c0_i32_1 = arith.constant 0 : i32
    %c0_i32_2 = arith.constant 0 : i32
    return %arg0, %1, %c0_i32, %c0_i32_1 : i32, i32, i32, i32
  }
  func.func @transform_6(%arg0: i32, %arg1: i32, %arg2: i32) -> (i32, i32) {
    %c0_i32 = arith.constant 0 : i32
    %c0_i32_0 = arith.constant 0 : i32
    return %c0_i32, %arg2 : i32, i32
  }
  func.func @transform_7(%arg0: i32, %arg1: i32, %arg2: i32) -> (i32, i32) {
    %c0_i32 = arith.constant 0 : i32
    %c0_i32_0 = arith.constant 0 : i32
    return %c0_i32, %arg2 : i32, i32
  }
  func.func @transform_8(%arg0: i32, %arg1: i32, %arg2: i32) -> (i32, i32) {
    %c0_i32 = arith.constant 0 : i32
    %c0_i32_0 = arith.constant 0 : i32
    return %c0_i32, %arg2 : i32, i32
  }
  func.func @transform_9(%arg0: i32, %arg1: i32, %arg2: i32) -> (i32, i32, i32, i32) {
    %c0_i32 = arith.constant 0 : i32
    %c0_i32_0 = arith.constant 0 : i32
    return %arg0, %arg1, %c0_i32, %arg2 : i32, i32, i32, i32
  }
}

</mosaic_0001>

<bundles_post_ra>
// kernel: inception_v3_module_e.11
= control target key start
LH: loop header
LB: loop body
LE: loop exit
PB: predicated region body
PF: predicated region fallthrough
CT: control target
= control target key end

     0   :  { %s863_s21 = smov 0   ;;  %s865_s22 = smov 0   ;;  %s938_s0 = inlined_call_operand.vmem [shape: f32[2,16,8,8], index: 0, kind: input, shape index: {}, may-alias: {0,2,4}]   ;;  %s939_s1 = inlined_call_operand.vmem [shape: f32[2,16,8,8], index: 1, kind: input, shape index: {}, may-alias: {1,3,5}]   ;;  %s940_s2 = inlined_call_operand.vmem [shape: f32[2,16,8,8], index: 2, kind: input, shape index: {}, may-alias: {0,2,4}]   ;;  %s941_s3 = inlined_call_operand.vmem [shape: f32[2,16,8,8], index: 3, kind: input, shape index: {}, may-alias: {1,3,5}]   ;;  %s942_s4 = inlined_call_operand.vmem [shape: f32[2,16,8,8], index: 4, kind: input, shape index: {}, may-alias: {0,2,4}]   ;;  %s943_s5 = inlined_call_operand.vmem [shape: f32[2,16,8,8], index: 5, kind: input, shape index: {}, may-alias: {1,3,5}]   ;;  %s944_s6 = inlined_call_operand.vmem [shape: f32[2,7,7,8], index: 6, kind: output, shape index: {}]  }
   0x1   :  { %s867_s23 = smov 0   ;;  %s869_s24 = smov 0  }
   0x2   :  { %s871_s25 = smov 0  }
   0x3 LB: > { %s25_s26 = sadd.s32 1, %s818_s23  ;;  %s28_s27 = sadd.s32 1, %s822_s24  ;;  %s826_s25 = sphi %s871_s25, %s16_s25   ;;  %s822_s24 = sphi %s869_s24, %s948_s24   ;;  %s818_s23 = sphi %s867_s23, %s947_s23   ;;  %s814_s22 = sphi %s865_s22, %s946_s22   ;;  %s810_s21 = sphi %s863_s21, %s945_s21  }
   0x4   : > { %p26_p0 = scmp.ge.s32.totalorder %s25_s26, 7  ;;  %p725_p1 = scmp.ge.s32.totalorder %s826_s25, 1 }
   0x5   : > { %p346_p2 = scmp.lt.s32.totalorder %s826_s25, 15 }
   0x6   : > { %s950_s26 = smov (%p26_p0, %s25_s26), 0  ;;  %s952_s27 = smov (!%p26_p0, %s28_s27), %s822_s24 }
   0x7   : > { %p347_p3 = pnand %p725_p1, %p346_p2  ;;  %p30_p4 = scmp.ge.s32.totalorder %s952_s27, 2 }
   0x8   : > { %s726_s28 = sshll.u32 (!%p347_p3), %s810_s21, 1  ;;  %p433_p5 = scmp.lt.s32.totalorder (!%p347_p3), %s814_s22, 1 }
   0x9   : > { %s954_s27 = smov (%p30_p4, %s952_s27), 0  ;;  %350 = sbr.rel (%p347_p3) target bundleno = 39 (0x27), region = 44 }
   0xa   : > { %p435_p6 = scmp.lt.s32.totalorder (!%p347_p3), %s726_s28, 15  ;;  %s453_s29 = sadd.s32 (!%p347_p3), 1, %s726_s28 }
   0xb   : > { %p456_p7 = scmp.lt.s32.totalorder (!%p347_p3), %s453_s29, 15  ;;  %s477_s9 = sadd.s32 (!%p347_p3), 2, %s726_s28 }
   0xc   : > { %p480_p8 = scmp.lt.s32.totalorder (!%p347_p3), %s477_s9, 15  ;;  %p502_p9 = scmp.lt.s32.totalorder (!%p347_p3), %s810_s21, 6 }
   0xe   : > { %s956_s22 = smov (!%p433_p5, %s814_s22), 1  ;;  %s958_s29 = smov (!%p456_p7, %s453_s29), 15  ;;  %vm531_vm0 = vcmask 63488  }
   0xf   : > { %s436_s30 = scalar_select %p435_p6, %s726_s28, 15 }
  0x10   : > { %s727_s7 = sshll.u32 %s956_s22, 4  ;;  %s960_s9 = smov (!%p480_p8, %s477_s9), 15 }
  0x11   : > { %s438_s8 = sadd.s32 %s727_s7, %s436_s30  ;;  %s459_s17 = sadd.s32 %s727_s7, %s958_s29 }
  0x12   : > { %s728_s10 = sshll.u32 %s438_s8, 3  ;;  %s734_s18 = sshll.u32 %s459_s17, 3 }
  0x13   : > { %s440_s13 = scalar_lea.vmem %s938_s0, %s728_s10  ;;  %s450_s16 = scalar_lea.vmem %s939_s1, %s728_s10 }
  0x14   : > { %v508_v0 = vld [vmem:[%s440_s13] sm:$0xff]  ;;  %s483_s19 = sadd.s32 %s727_s7, %s960_s9  ;;  %s461_s30 = scalar_lea.vmem %s940_s2, %s734_s18 }
  0x15   : > { %v509_v1 = vld [vmem:[%s450_s16] sm:$0xff]  ;;  %v512_v3 = vrot.slane %v508_v0, 1  ;;  %s473_s10 = scalar_lea.vmem %s941_s3, %s734_s18  ;;  %s740_s12 = sshll.u32 %s483_s19, 3 }
  0x16   : > { %v510_v2 = vmax.f32 %v508_v0, %v509_v1  ;;  %s747_s13 = smul.u32 7, %s956_s22  ;;  %v515_v5 = vld [vmem:[%s461_s30] sm:$0xff]  ;;  %s485_s29 = scalar_lea.vmem %s942_s4, %s740_s12 }
  0x17   : > { %v517_v6 = vld [vmem:[%s473_s10] sm:$0xff]  ;;  %v520_v8 = vrot.slane %v515_v5, 1  ;;  %s962_s21 = smov (!%p502_p9, %s810_s21), 6  ;;  %s497_s16 = scalar_lea.vmem %s943_s5, %s740_s12 }
  0x18   : > { %v514_v4 = vmax.f32 %v510_v2, %v512_v3  ;;  %s505_s17 = sadd.s32 %s747_s13, %s962_s21  ;;  %v523_v10 = vld [vmem:[%s485_s29] sm:$0xff] }
  0x19   : > { %v525_v12 = vld [vmem:[%s497_s16] sm:$0xff]  ;;  %s744_s18 = sshll.u32 %s505_s17, 3  ;;  %v528_v14 = vrot.slane %v523_v10, 1 }
  0x1a   : > { %v516_v7 = vmax.f32 %v514_v4, %v515_v5  ;;  %s507_s20 = scalar_lea.vmem %s944_s6, %s744_s18 }
  0x1c   : > { %v518_v9 = vmax.f32 %v516_v7, %v517_v6 }
  0x1e   : > { %v522_v11 = vmax.f32 %v518_v9, %v520_v8 }
  0x20   : > { %v524_v13 = vmax.f32 %v522_v11, %v523_v10 }
  0x22   : > { %v526_v15 = vmax.f32 %v524_v13, %v525_v12 }
  0x24   : > { %v530_v16 = vmax.f32 %v526_v15, %v528_v14 }
  0x26   : > { %532 = vst.msk [vmem:[%s507_s20] sm:$0x7f] %vm531_vm0, %v530_v16 }
  0x27 PF: > { %s16_s25 = sadd.s32 1, %s826_s25   ;;  %s945_s21 = smov %s818_s23 }
  0x28   : > { %p13_p10 = scmp.ge.s32.totalorder %s16_s25, 16   ;;  %s946_s22 = smov %s822_s24 }
  0x29   : > { %s947_s23 = smov %s950_s26  ;;  %s948_s24 = smov %s954_s27 }
  0x2a   :  { %15 = sbr.rel (!%p13_p10) target bundleno = 3 (0x3), region = 89 }

// kernel: inception_v3_module_e.6
= control target key start
LH: loop header
LB: loop body
LE: loop exit
PB: predicated region body
PF: predicated region fallthrough
CT: control target
= control target key end

     0   :  { %s932_s15 = smov 0   ;;  %s934_s16 = smov 0   ;;  %s1035_s0 = inlined_call_operand.vmem [shape: bf16[512,8], index: 0, kind: input, shape index: {}]   ;;  %s1036_s1 = inlined_call_operand.vmem [shape: bf16[8,128], index: 1, kind: input, shape index: {}]   ;;  %s1037_s2 = inlined_call_operand.vmem [shape: f32[1,128], index: 2, kind: input, shape index: {}]   ;;  %s1038_s3 = inlined_call_operand.vmem [shape: f32[1,128], index: 3, kind: input, shape index: {}]   ;;  %s1039_s4 = inlined_call_operand.vmem [shape: bf16[512,128], index: 4, kind: output, shape index: {}]  }
   0x1   :  { %s936_s17 = smov 0  }
   0x2 LB: > { %s33_s18 = sadd.s32 1, %s901_s16  ;;  %p752_p0 = scmp.ge.s32.totalorder %s905_s17, 1  ;;  %s905_s17 = sphi %s936_s17, %s14_s17   ;;  %s901_s16 = sphi %s934_s16, %s1041_s16   ;;  %s897_s15 = sphi %s932_s15, %s1040_s15  }
   0x3   : > { %p35_p1 = scmp.ge.s32.totalorder %s33_s18, 4  ;;  %p219_p2 = scmp.lt.s32.totalorder %s905_s17, 5 }
   0x5   : > { %s1043_s18 = smov (%p35_p1, %s33_s18), 0  ;;  %p220_p3 = pnand %p752_p0, %p219_p2 }
   0x6   : > { %s753_s21 = sshll.u32 (!%p220_p3), %s897_s15, 4 }
   0x7   : > { %223 = sbr.rel (%p220_p3) target bundleno = 186 (0xba), region = 36  ;;  %p265_p4 = scmp.lt.s32.totalorder (!%p220_p3), %s753_s21, 63 }
   0xc   : > { %v348_v0 = vld [vmem:[%s1036_s1] sm:$0xf]  ;;  %vm414_vm0 = vcmask 1043456   ;;  %s1045_s21 = smov (!%p265_p4, %s753_s21), 63  ;;  %vm389_vm1 = vcmask 64512  }
   0xd   : > { %v416_v1 = vsel %vm414_vm0, %v348_v0, 0  ;;  %s754_s22 = sshll.u32 %s1045_s21, 2  ;;  %v972_v10 = vld [vmem:[%s1037_s2] ss:$0 sm:$0xff] }
   0xe   : > { %425 = vmatpush.bf16.msra.mxu0 %v416_v1  ;;  %854 = vmatpush.bf16.msra.mxu1 %v416_v1  ;;  %s271_s25 = scalar_lea.vmem %s1035_s0, %s754_s22  ;;  %v978_v14 = vld [vmem:[%s1038_s3] ss:$0 sm:$0xff]  ;;  %s996_s6 = scalar_lea.vmem %s1039_s4, %s754_s22 }
   0xf   : > { %855 = vmatpush.bf16.msra.mxu2 %v416_v1  ;;  %856 = vmatpush.bf16.msra.mxu3 %v416_v1  ;;  %v799_v2 = vld [vmem:[%s271_s25] sm:$0xff]  ;;  %v801_v3 = vld [vmem:[%s271_s25 + $0x10] sm:$0xff]  ;;  %v800_v6 = vld [vmem:[%s271_s25 + $0x8] sm:$0xff] }
  0x10   : > { %v803_v4 = vld [vmem:[%s271_s25 + $0x20] sm:$0xff]  ;;  %v805_v5 = vld [vmem:[%s271_s25 + $0x30] sm:$0xff]  ;;  %v802_v7 = vld [vmem:[%s271_s25 + $0x18] sm:$0xff] }
  0x11   : > { %789 = vmatmul.msk.bf16.vlgmr.msra.gmra.mxu0 %vm389_vm1, %v799_v2  ;;  %791 = vmatmul.msk.bf16.vlgmr.msra.gmra.mxu1 %vm389_vm1, %v801_v3  ;;  %v804_v8 = vld [vmem:[%s271_s25 + $0x28] sm:$0xff]  ;;  %v806_v9 = vld [vmem:[%s271_s25 + $0x38] sm:$0xff] }
  0x12   : > { %793 = vmatmul.msk.bf16.vlgmr.msra.gmra.mxu2 %vm389_vm1, %v803_v4  ;;  %795 = vmatmul.msk.bf16.vlgmr.msra.gmra.mxu3 %vm389_vm1, %v805_v5 }
  0x21   : > { %790 = vmatmul.msk.bf16.gmra.mxu0 %vm389_vm1, %v800_v6  ;;  %792 = vmatmul.msk.bf16.gmra.mxu1 %vm389_vm1, %v802_v7 }
  0x22   : > { %794 = vmatmul.msk.bf16.gmra.mxu2 %vm389_vm1, %v804_v8  ;;  %796 = vmatmul.msk.bf16.gmra.mxu3 %vm389_vm1, %v806_v9 }
  0x8e   : > { %v427_v11 = vpop.f32.mrf.mxu0  ;;  %v437_v12 = vpop.f32.mrf.mxu1 }
  0x8f   : > { %v522_v13 = vmul.f32 %v972_v10, %v427_v11  ;;  %v526_v15 = vmul.f32 %v972_v10, %v437_v12 }
  0x91   : > { %v542_v16 = vadd.f32 %v978_v14, %v522_v13  ;;  %v546_v17 = vadd.f32 %v978_v14, %v526_v15 }
  0x93   : > { %v558_v26 = vmax.f32 %v542_v16, 0.0  ;;  %v562_v27 = vmax.f32 %v546_v17, 0.0 }
  0x95   : > { %v447_v18 = vpop.f32.mrf.mxu2  ;;  %v457_v19 = vpop.f32.mrf.mxu3  ;;  %v574_v34 = vmin.f32 %v558_v26, 6.0  ;;  %v578_v35 = vmin.f32 %v562_v27, 6.0 }
  0x96   : > { %v429_v20 = vpop.f32.mrf.mxu0  ;;  %v439_v21 = vpop.f32.mrf.mxu1  ;;  %v530_v24 = vmul.f32 %v972_v10, %v447_v18  ;;  %v534_v25 = vmul.f32 %v972_v10, %v457_v19 }
  0x97   : > { %v523_v22 = vmul.f32 %v972_v10, %v429_v20  ;;  %v527_v23 = vmul.f32 %v972_v10, %v439_v21 }
  0x98   : > { %v550_v32 = vadd.f32 %v978_v14, %v530_v24  ;;  %v554_v33 = vadd.f32 %v978_v14, %v534_v25 }
  0x99   : > { %v543_v28 = vadd.f32 %v978_v14, %v523_v22  ;;  %v547_v29 = vadd.f32 %v978_v14, %v527_v23 }
  0x9a   : > { %v566_v46 = vmax.f32 %v550_v32, 0.0  ;;  %v570_v47 = vmax.f32 %v554_v33, 0.0 }
  0x9b   : > { %v559_v30 = vmax.f32 %v543_v28, 0.0  ;;  %v563_v31 = vmax.f32 %v547_v29, 0.0 }
  0x9c   : > { %v582_v54 = vmin.f32 %v566_v46, 6.0  ;;  %v586_v55 = vmin.f32 %v570_v47, 6.0 }
  0x9d   : > { %v575_v36 = vmin.f32 %v559_v30, 6.0  ;;  %v579_v37 = vmin.f32 %v563_v31, 6.0  ;;  %v449_v38 = vpop.f32.mrf.mxu2  ;;  %v459_v39 = vpop.f32.mrf.mxu3 }
  0x9e   : > { %v531_v40 = vmul.f32 %v972_v10, %v449_v38  ;;  %v535_v41 = vmul.f32 %v972_v10, %v459_v39  ;;  %v432_v42 = vpop.f32.mrf.mxu0  ;;  %v442_v43 = vpop.f32.mrf.mxu1 }
  0x9f   : > { %v810_v44 = vpack.c.bf16 %v575_v36, %v574_v34  ;;  %v820_v45 = vpack.c.bf16 %v579_v37, %v578_v35  ;;  %v524_v50 = vmul.f32 %v972_v10, %v432_v42  ;;  %v528_v51 = vmul.f32 %v972_v10, %v442_v43 }
  0xa0   : > { %v551_v48 = vadd.f32 %v978_v14, %v531_v40  ;;  %v555_v49 = vadd.f32 %v978_v14, %v535_v41 }
  0xa1   : > { %811 = vst [vmem:[%s996_s6] sm:$0xff] %v810_v44   ;;  %v544_v58 = vadd.f32 %v978_v14, %v524_v50  ;;  %v548_v59 = vadd.f32 %v978_v14, %v528_v51 }
  0xa2   : > { %848 = vst [vmem:[%s996_s6 + $0x10] sm:$0xff] %v820_v45   ;;  %v567_v52 = vmax.f32 %v551_v48, 0.0  ;;  %v571_v53 = vmax.f32 %v555_v49, 0.0 }
  0xa3   : > { %v560_v6 = vmax.f32 %v544_v58, 0.0  ;;  %v564_v7 = vmax.f32 %v548_v59, 0.0 }
  0xa4   : > { %v583_v56 = vmin.f32 %v567_v52, 6.0  ;;  %v587_v57 = vmin.f32 %v571_v53, 6.0 }
  0xa5   : > { %v452_v60 = vpop.f32.mrf.mxu2  ;;  %v462_v61 = vpop.f32.mrf.mxu3  ;;  %v576_v16 = vmin.f32 %v560_v6, 6.0  ;;  %v580_v17 = vmin.f32 %v564_v7, 6.0 }
  0xa6   : > { %v830_v62 = vpack.c.bf16 %v583_v56, %v582_v54  ;;  %v840_v63 = vpack.c.bf16 %v587_v57, %v586_v55  ;;  %v434_v0 = vpop.f32.mrf.mxu0  ;;  %v444_v1 = vpop.f32.mrf.mxu1  ;;  %v532_v4 = vmul.f32 %v972_v10, %v452_v60  ;;  %v536_v5 = vmul.f32 %v972_v10, %v462_v61 }
  0xa7   : > { %v525_v2 = vmul.f32 %v972_v10, %v434_v0  ;;  %v529_v3 = vmul.f32 %v972_v10, %v444_v1 }
  0xa8   : > { %850 = vst [vmem:[%s996_s6 + $0x20] sm:$0xff] %v830_v62   ;;  %v552_v13 = vadd.f32 %v978_v14, %v532_v4  ;;  %v556_v15 = vadd.f32 %v978_v14, %v536_v5 }
  0xa9   : > { %852 = vst [vmem:[%s996_s6 + $0x30] sm:$0xff] %v840_v63   ;;  %v545_v8 = vadd.f32 %v978_v14, %v525_v2  ;;  %v549_v9 = vadd.f32 %v978_v14, %v529_v3 }
  0xaa   : > { %v568_v26 = vmax.f32 %v552_v13, 0.0  ;;  %v572_v27 = vmax.f32 %v556_v15, 0.0 }
  0xab   : > { %v561_v11 = vmax.f32 %v545_v8, 0.0  ;;  %v565_v12 = vmax.f32 %v549_v9, 0.0 }
  0xac   : > { %v584_v32 = vmin.f32 %v568_v26, 6.0  ;;  %v588_v33 = vmin.f32 %v572_v27, 6.0 }
  0xad   : > { %v577_v18 = vmin.f32 %v561_v11, 6.0  ;;  %v581_v19 = vmin.f32 %v565_v12, 6.0  ;;  %v454_v20 = vpop.f32.mrf.mxu2  ;;  %v464_v21 = vpop.f32.mrf.mxu3 }
  0xae   : > { %v533_v22 = vmul.f32 %v972_v10, %v454_v20  ;;  %v537_v23 = vmul.f32 %v972_v10, %v464_v21 }
  0xaf   : > { %v815_v24 = vpack.c.bf16 %v577_v18, %v576_v16  ;;  %v825_v25 = vpack.c.bf16 %v581_v19, %v580_v17 }
  0xb0   : > { %v553_v28 = vadd.f32 %v978_v14, %v533_v22  ;;  %v557_v29 = vadd.f32 %v978_v14, %v537_v23 }
  0xb1   : > { %847 = vst [vmem:[%s996_s6 + $0x8] sm:$0xff] %v815_v24  }
  0xb2   : > { %849 = vst [vmem:[%s996_s6 + $0x18] sm:$0xff] %v825_v25   ;;  %v569_v30 = vmax.f32 %v553_v28, 0.0  ;;  %v573_v31 = vmax.f32 %v557_v29, 0.0 }
  0xb4   : > { %v585_v34 = vmin.f32 %v569_v30, 6.0  ;;  %v589_v35 = vmin.f32 %v573_v31, 6.0 }
  0xb6   : > { %v835_v36 = vpack.c.bf16 %v585_v34, %v584_v32  ;;  %v845_v10 = vpack.c.bf16 %v589_v35, %v588_v33 }
  0xb8   : > { %851 = vst [vmem:[%s996_s6 + $0x28] sm:$0xff] %v835_v36  }
  0xb9   : > { %853 = vst [vmem:[%s996_s6 + $0x38] sm:$0xff] %v845_v10  }
  0xba PF: > { %s14_s17 = sadd.s32 1, %s905_s17   ;;  %s1040_s15 = smov %s901_s16 }
  0xbb   : > { %p11_p5 = scmp.ge.s32.totalorder %s14_s17, 6   ;;  %s1041_s16 = smov %s1043_s18 }
  0xbd   :  { %13 = sbr.rel (!%p11_p5) target bundleno = 2 (0x2), region = 83 }

// kernel: inception_v3_module_e.8
= control target key start
LH: loop header
LB: loop body
LE: loop exit
PB: predicated region body
PF: predicated region fallthrough
CT: control target
= control target key end

     0   :  { %s1398_s15 = smov 0   ;;  %s1400_s16 = smov 0   ;;  %s1907_s0 = inlined_call_operand.vmem [shape: bf16[32,22,8], index: 0, kind: input, shape index: {}]   ;;  %s1908_s1 = inlined_call_operand.vmem [shape: bf16[56,128], index: 1, kind: input, shape index: {}]   ;;  %s1909_s2 = inlined_call_operand.vmem [shape: f32[1,128], index: 2, kind: input, shape index: {}]   ;;  %s1910_s3 = inlined_call_operand.vmem [shape: f32[1,128], index: 3, kind: input, shape index: {}]   ;;  %s1911_s4 = inlined_call_operand.vmem [shape: bf16[512,128], index: 4, kind: output, shape index: {}]  }
   0x1   :  { %s1402_s17 = smov 0  }
   0x2 LB: > { %s26_s18 = sadd.s32 1, %s1361_s16  ;;  %p1181_p0 = scmp.ge.s32.totalorder %s1365_s17, 1  ;;  %s1365_s17 = sphi %s1402_s17, %s14_s17   ;;  %s1361_s16 = sphi %s1400_s16, %s1913_s16   ;;  %s1357_s15 = sphi %s1398_s15, %s1912_s15  }
   0x3   : > { %p28_p1 = scmp.ge.s32.totalorder %s26_s18, 4  ;;  %p203_p2 = scmp.lt.s32.totalorder %s1365_s17, 5 }
   0x5   : > { %s1915_s18 = smov (%p28_p1, %s26_s18), 0  ;;  %p204_p3 = pnand %p1181_p0, %p203_p2 }
   0x6   : > { %s1182_s19 = sshll.u32 (!%p204_p3), %s1357_s15, 3  ;;  %s1367_s24 = smov (!%p204_p3), 32  }
   0x7   : > { %207 = sbr.rel (%p204_p3) target bundleno = 406 (0x196), region = 36  ;;  %p244_p4 = scmp.lt.s32.totalorder (!%p204_p3), %s1182_s19, 31 }
   0x8   : > { %s1368_s25 = smov (!%p204_p3), 16   ;;  %s1369_s26 = smov (!%p204_p3), 8  }
   0x9   : > { %s1370_s27 = smov (!%p204_p3), 24   ;;  %s1371_s28 = smov (!%p204_p3), 48  }
   0xa   : > { %s1372_s29 = smov (!%p204_p3), 40   ;;  %s1184_s14 = sshll.u32 (!%p204_p3), %s1357_s15, 4 }
   0xb   : > { %p261_p5 = scmp.lt.s32.totalorder (!%p204_p3), %s1184_s14, 63 }
   0xc   : > { %s1917_s19 = smov (!%p244_p4, %s1182_s19), 31  ;;  %vm335_vm0 = vcmask 1045504   ;;  %vm317_vm1 = vcmask 1046528   ;;  %vm302_vm2 = vsmask.f32 7424  ;;  %vm351_vm4 = vcmask 1044480  }
   0xd   : > { %s1310_s20 = smul.u32 12, %s1917_s19  ;;  %vm323_vm3 = vsmask.f32 6400  ;;  %vm341_vm5 = vsmask.f32 5376  ;;  %vm903_vm6 = vcmask 1043456  }
   0xe   : > { %vm357_vm7 = vcmask 64512   ;;  %vm360_vm8 = vcmask 130048   ;;  %vm363_vm9 = vcmask 195584   ;;  %vm366_vm10 = vcmask 261120   ;;  %s1919_s14 = smov (!%p261_p5, %s1184_s14), 63 }
   0xf   : > { %s1422_s23 = scalar_lea.vmem %s1907_s0, %s1310_s20  ;;  %vm369_vm11 = vcmask 326656   ;;  %vm372_vm12 = vcmask 392192   ;;  %vm886_vm13 = vcmask 457728   ;;  %s1185_s15 = sshll.u32 %s1919_s14, 2 }
  0x10   : > { %v1425_v0 = vld [vmem:[%s1422_s23 + $0x30] sm:$0xff]  ;;  %v284_v1 = vld [vmem:[%s1422_s23 + $0x38] sm:$0x7]  ;;  %v1437_v9 = vld [vmem:[%s1422_s23 + $0x48] sm:$0xff] }
  0x11   : > { %v588_v2 = vunpack.c.l.b16 %v284_v1  ;;  %v290_v3 = vld [vmem:[%s1422_s23 + $0x50] sm:$0x7]  ;;  %v620_v6 = vrot.slane %v1425_v0, 2  ;;  %v604_v7 = vrot.slane %v1425_v0, 1  ;;  %v1434_v8 = vshll.u32 %v1425_v0, 16  ;;  %v1479_v55 = vld [vmem:[%s1422_s23 + $0x18] sm:$0xff] }
  0x12   : > { %v726_v4 = vunpack.c.l.b16 %v290_v3  ;;  %v1442_v11 = vshrl.u32 %v1425_v0, 16  ;;  %v742_v18 = vrot.slane %v1437_v9, 1  ;;  %v731_v21 = vshll.u32 %v1437_v9, 16  ;;  %v278_v47 = vld [vmem:[%s1422_s23 + $0x20] sm:$0x7] }
  0x13   : > { %v1429_v5 = vpack.c.b16 %v588_v2, %v588_v2  ;;  %v595_v14 = vrot.slane %v1434_v8, 1  ;;  %v610_v24 = vrot.slane %v1434_v8, 2  ;;  %v729_v29 = vshrl.u32 %v1437_v9, 16  ;;  %v272_v48 = vld [vmem:[%s1422_s23 + $0x8] sm:$0x7]  ;;  %v1482_v57 = vld [vmem:[%s1422_s23] sm:$0xff] }
  0x14   : > { %v1439_v10 = vpack.c.b16 %v726_v4, %v726_v4  ;;  %v609_v23 = vrot.slane %v1442_v11, 1  ;;  %v733_v34 = vrot.slane %v731_v21, 1  ;;  %v748_v37 = vrot.slane %v731_v21, 2 }
  0x15   : > { %v621_v12 = vrot.slane %v1429_v5, 2  ;;  %v605_v13 = vrot.slane %v1429_v5, 1  ;;  %v1448_v15 = vshll.u32 %v1429_v5, 16  ;;  %v596_v20 = vor.u32 %v595_v14, %v1442_v11 }
  0x16   : > { %v743_v19 = vrot.slane %v1439_v10, 1  ;;  %v612_v25 = vshrl.u32 %v1429_v5, 16  ;;  %v611_v27 = vor.u32 %v610_v24, %v609_v23  ;;  %v736_v30 = vshll.u32 %v1439_v10, 16 }
  0x17   : > { %v622_v16 = vsel %vm335_vm0, %v620_v6, %v621_v12  ;;  %v606_v17 = vsel %vm317_vm1, %v604_v7, %v605_v13  ;;  %v600_v22 = vrot.slane %v1448_v15, 1  ;;  %v615_v26 = vrot.slane %v1448_v15, 2 }
  0x18   : > { %623 = vrot.lane.b32.xlu0 %v622_v16, %s1367_s24  ;;  %607 = vrot.lane.b32.xlu1 %v606_v17, %s1368_s25  ;;  %v614_v28 = vrot.slane %v612_v25, 1  ;;  %v750_v31 = vshrl.u32 %v1439_v10, 16  ;;  %v744_v32 = vsel %vm317_vm1, %v742_v18, %v743_v19  ;;  %v747_v36 = vrot.slane %v729_v29, 1 }
  0x19   : > { %v601_v33 = vsel %vm302_vm2, %v596_v20, %v600_v22  ;;  %v753_v39 = vrot.slane %v736_v30, 2  ;;  %v758_v40 = vrot.slane %v1437_v9, 2  ;;  %v759_v41 = vrot.slane %v1439_v10, 2 }
  0x1a   : > { %v616_v35 = vor.u32 %v615_v26, %v614_v28  ;;  %v752_v38 = vrot.slane %v750_v31, 1  ;;  %v734_v43 = vor.u32 %v733_v34, %v729_v29  ;;  %v738_v44 = vrot.slane %v736_v30, 1 }
  0x1b   : > { %v749_v45 = vor.u32 %v748_v37, %v747_v36  ;;  %v760_v49 = vsel %vm335_vm0, %v758_v40, %v759_v41  ;;  %v763_v50 = vrot.slane %v729_v29, 2  ;;  %v764_v51 = vrot.slane %v731_v21, 3 }
  0x1c   : > { %v617_v42 = vsel %vm323_vm3, %v611_v27, %v616_v35  ;;  %v754_v46 = vor.u32 %v753_v39, %v752_v38  ;;  %v766_v52 = vrot.slane %v750_v31, 2  ;;  %v767_v53 = vrot.slane %v736_v30, 3 }
  0x1d   : > { %618 = vrot.lane.b32.xlu2 %v617_v42, %s1370_s27  ;;  %v739_v54 = vsel %vm302_vm2, %v734_v43, %v738_v44  ;;  %v450_v56 = vunpack.c.l.b16 %v278_v47  ;;  %v300_v58 = vunpack.c.l.b16 %v272_v48  ;;  %v625_v59 = vrot.slane %v1442_v11, 2 }
  0x1e   : > { %v755_v60 = vsel %vm323_vm3, %v749_v45, %v754_v46  ;;  %v626_v61 = vrot.slane %v1434_v8, 3  ;;  %v628_v62 = vrot.slane %v612_v25, 2  ;;  %v629_v63 = vrot.slane %v1448_v15, 3 }
  0x1f   : > { %v634_v1 = vrot.slane %v1425_v0, 3  ;;  %v635_v2 = vrot.slane %v1429_v5, 3  ;;  %v765_v3 = vor.u32 %v764_v51, %v763_v50  ;;  %v768_v4 = vor.u32 %v767_v53, %v766_v52  ;;  %v293_v53 = vld [vmem:[%s1422_s23 + $0x5c] sm:$0x7] }
  0x20   : > { %745 = vrot.lane.b32.xlu1 %v744_v32, %s1368_s25  ;;  %602 = vrot.lane.b32.xlu0 %v601_v33, %s1369_s26  ;;  %v1493_v6 = vpack.c.b16 %v450_v56, %v450_v56  ;;  %v1496_v7 = vshll.u32 %v1479_v55, 16  ;;  %v1498_v8 = vpack.c.b16 %v300_v58, %v300_v58  ;;  %v1501_v11 = vshll.u32 %v1482_v57, 16 }
  0x21   : > { %v627_v12 = vor.u32 %v626_v61, %v625_v59  ;;  %v630_v13 = vor.u32 %v629_v63, %v628_v62  ;;  %v636_v14 = vsel %vm351_vm4, %v634_v1, %v635_v2  ;;  %v769_v5 = vsel %vm341_vm5, %v765_v3, %v768_v4  ;;  %v1560_v59 = vld [vmem:[%s1422_s23 + $0x54] sm:$0xff]  ;;  %v1566_v1 = vld [vmem:[%s1422_s23 + $0x3c] sm:$0xff] }
  0x22   : > { %v1506_v15 = vshrl.u32 %v1479_v55, 16  ;;  %v1509_v16 = vshrl.u32 %v1482_v57, 16  ;;  %v457_v17 = vrot.slane %v1496_v7, 1  ;;  %v1513_v18 = vshll.u32 %v1493_v6, 16 }
  0x23   : > { %v308_v19 = vrot.slane %v1501_v11, 1  ;;  %v1517_v20 = vshll.u32 %v1498_v8, 16  ;;  %v631_v21 = vsel %vm341_vm5, %v627_v12, %v630_v13  ;;  %v327_v22 = vshrl.u32 %v1498_v8, 16 }
  0x24   : > { %v458_v23 = vor.u32 %v457_v17, %v1506_v15  ;;  %v462_v24 = vrot.slane %v1513_v18, 1  ;;  %v772_v27 = vrot.slane %v1437_v9, 3  ;;  %v773_v28 = vrot.slane %v1439_v10, 3 }
  0x25   : > { %756 = vrot.lane.b32.xlu2 %v755_v60, %s1370_s27  ;;  %v309_v25 = vor.u32 %v308_v19, %v1509_v16  ;;  %v313_v26 = vrot.slane %v1517_v20, 1  ;;  %v324_v29 = vrot.slane %v1509_v16, 1  ;;  %v325_v30 = vrot.slane %v1501_v11, 2 }
  0x26   : > { %v329_v31 = vrot.slane %v327_v22, 1  ;;  %v330_v32 = vrot.slane %v1517_v20, 2  ;;  %v463_v33 = vsel %vm302_vm2, %v458_v23, %v462_v24  ;;  %v774_v35 = vsel %vm351_vm4, %v772_v27, %v773_v28 }
  0x27   : > { %v314_v34 = vsel %vm302_vm2, %v309_v25, %v313_v26  ;;  %v326_v36 = vor.u32 %v325_v30, %v324_v29  ;;  %v466_v10 = vrot.slane %v1479_v55, 1  ;;  %v467_v38 = vrot.slane %v1493_v6, 1 }
  0x28   : > { %761 = vrot.lane.b32.xlu1 %v760_v49, %s1367_s24  ;;  %740 = vrot.lane.b32.xlu0 %v739_v54, %s1369_s26  ;;  %v331_v37 = vor.u32 %v330_v32, %v329_v31  ;;  %v318_v39 = vrot.slane %v1482_v57, 1  ;;  %v319_v40 = vrot.slane %v1498_v8, 1  ;;  %v474_v41 = vshrl.u32 %v1493_v6, 16  ;;  %v287_v54 = vld [vmem:[%s1422_s23 + $0x44] sm:$0x7] }
  0x29   : > { %v468_v43 = vsel %vm317_vm1, %v466_v10, %v467_v38  ;;  %v471_v44 = vrot.slane %v1506_v15, 1  ;;  %v472_v45 = vrot.slane %v1496_v7, 2  ;;  %v477_v47 = vrot.slane %v1513_v18, 2  ;;  %v1614_v38 = vld [vmem:[%s1422_s23 + $0xc] sm:$0xff] }
  0x2a   : > { %v332_v42 = vsel %vm323_vm3, %v326_v36, %v331_v37  ;;  %v476_v46 = vrot.slane %v474_v41, 1  ;;  %v320_v48 = vsel %vm317_vm1, %v318_v39, %v319_v40  ;;  %v482_v49 = vrot.slane %v1479_v55, 2  ;;  %v1611_v37 = vld [vmem:[%s1422_s23 + $0x24] sm:$0xff] }
  0x2b   : > { %v483_v50 = vrot.slane %v1493_v6, 2  ;;  %v336_v51 = vrot.slane %v1482_v57, 2  ;;  %v337_v52 = vrot.slane %v1498_v8, 2  ;;  %v473_v56 = vor.u32 %v472_v45, %v471_v44 }
  0x2c   : > { %v478_v58 = vor.u32 %v477_v47, %v476_v46  ;;  %v795_v60 = vunpack.c.l.b16 %v293_v53  ;;  %v487_v63 = vrot.slane %v1506_v15, 2  ;;  %v657_v2 = vunpack.c.l.b16 %v287_v54 }
  0x2d   : > { %632 = vrot.lane.b32.xlu2 %v631_v21, %s1372_s29  ;;  %v484_v61 = vsel %vm335_vm0, %v482_v49, %v483_v50  ;;  %v338_v62 = vsel %vm335_vm0, %v336_v51, %v337_v52  ;;  %v488_v3 = vrot.slane %v1496_v7, 3  ;;  %v490_v4 = vrot.slane %v474_v41, 2 }
  0x2e   : > { %v491_v12 = vrot.slane %v1513_v18, 3  ;;  %v479_v13 = vsel %vm323_vm3, %v473_v56, %v478_v58  ;;  %v345_v17 = vrot.slane %v327_v22, 2  ;;  %v346_v19 = vrot.slane %v1517_v20, 3 }
  0x2f   : > { %v1574_v21 = vpack.c.b16 %v795_v60, %v795_v60  ;;  %v1577_v15 = vshll.u32 %v1560_v59, 16  ;;  %v1581_v7 = vpack.c.b16 %v657_v2, %v657_v2  ;;  %v1584_v18 = vshll.u32 %v1566_v1, 16 }
  0x30   : > { %637 = vrot.lane.b32.xlu1 %v636_v14, %s1371_s28  ;;  %770 = vrot.lane.b32.xlu0 %v769_v5, %s1372_s29  ;;  %v342_v14 = vrot.slane %v1509_v16, 2  ;;  %v343_v5 = vrot.slane %v1501_v11, 3  ;;  %v352_v16 = vrot.slane %v1482_v57, 3  ;;  %v353_v11 = vrot.slane %v1498_v8, 3 }
  0x31   : > { %v489_v20 = vor.u32 %v488_v3, %v487_v63  ;;  %v492_v22 = vor.u32 %v491_v12, %v490_v4  ;;  %v347_v24 = vor.u32 %v346_v19, %v345_v17  ;;  %v1590_v25 = vshrl.u32 %v1560_v59, 16 }
  0x32   : > { %v344_v23 = vor.u32 %v343_v5, %v342_v14  ;;  %v802_v26 = vrot.slane %v1577_v15, 1  ;;  %v1594_v27 = vshll.u32 %v1574_v21, 16  ;;  %v1597_v28 = vshrl.u32 %v1566_v1, 16 }
  0x33   : > { %v664_v8 = vrot.slane %v1584_v18, 1  ;;  %v1601_v29 = vshll.u32 %v1581_v7, 16  ;;  %v354_v30 = vsel %vm351_vm4, %v352_v16, %v353_v11  ;;  %v493_v31 = vsel %vm341_vm5, %v489_v20, %v492_v22 }
  0x34   : > { %v348_v32 = vsel %vm341_vm5, %v344_v23, %v347_v24  ;;  %v807_v36 = vrot.slane %v1594_v27, 1  ;;  %v1626_v45 = vshrl.u32 %v1611_v37, 16  ;;  %v1629_v46 = vshll.u32 %v1611_v37, 16 }
  0x35   : > { %775 = vrot.lane.b32.xlu2 %v774_v35, %s1371_s28  ;;  %v803_v35 = vor.u32 %v802_v26, %v1590_v25  ;;  %v665_v40 = vor.u32 %v664_v8, %v1597_v28  ;;  %v669_v41 = vrot.slane %v1601_v29, 1  ;;  %v496_v49 = vrot.slane %v1479_v55, 3 }
  0x36   : > { %v497_v50 = vrot.slane %v1493_v6, 3  ;;  %v1637_v51 = vshll.u32 %v1614_v38, 16  ;;  %v526_v52 = vrot.slane %v1629_v46, 1  ;;  %v1644_v54 = vshrl.u32 %v1614_v38, 16 }
  0x37   : > { %v808_v58 = vsel %vm302_vm2, %v803_v35, %v807_v36  ;;  %v811_v17 = vrot.slane %v1560_v59, 1  ;;  %v812_v19 = vrot.slane %v1574_v21, 1  ;;  %v673_v11 = vrot.slane %v1566_v1, 1 }
  0x38   : > { %464 = vrot.lane.b32.xlu1 %v463_v33, %s1369_s26  ;;  %315 = vrot.lane.b32.xlu0 %v314_v34, %s1369_s26  ;;  %v281_v33 = vld [vmem:[%s1422_s23 + $0x2c] sm:$0x7]  ;;  %v275_v34 = vld [vmem:[%s1422_s23 + $0x14] sm:$0x7]  ;;  %v388_v6 = vrot.slane %v1637_v51, 1  ;;  %v527_v63 = vor.u32 %v526_v52, %v1626_v45  ;;  %v498_v4 = vsel %vm351_vm4, %v496_v49, %v497_v50  ;;  %v674_v20 = vrot.slane %v1581_v7, 1  ;;  %s1864_s23 = scalar_lea.vmem %s1911_s4, %s1185_s15 }
  0x39   : > { %v519_v10 = vunpack.c.l.b16 %v281_v33  ;;  %v381_v39 = vunpack.c.l.b16 %v275_v34  ;;  %v819_v22 = vshrl.u32 %v1574_v21, 16  ;;  %v813_v24 = vsel %vm317_vm1, %v811_v17, %v812_v19 }
  0x3a   : > { %v389_v12 = vor.u32 %v388_v6, %v1644_v54  ;;  %v816_v26 = vrot.slane %v1590_v25, 1  ;;  %v817_v8 = vrot.slane %v1577_v15, 2  ;;  %v827_v33 = vrot.slane %v1560_v59, 2 }
  0x3b   : > { %v1623_v44 = vpack.c.b16 %v519_v10, %v519_v10  ;;  %v1631_v47 = vpack.c.b16 %v381_v39, %v381_v39  ;;  %v828_v34 = vrot.slane %v1574_v21, 2  ;;  %v689_v35 = vrot.slane %v1566_v1, 2 }
  0x3c   : > { %v690_v36 = vrot.slane %v1581_v7, 2  ;;  %v818_v10 = vor.u32 %v817_v8, %v816_v26  ;;  %v835_v49 = vrot.slane %v819_v22, 2  ;;  %v836_v50 = vrot.slane %v1594_v27, 3 }
  0x3d   : > { %321 = vrot.lane.b32.xlu2 %v320_v48, %s1368_s25  ;;  %v679_v48 = vrot.slane %v1584_v18, 2  ;;  %v1641_v53 = vshll.u32 %v1623_v44, 16  ;;  %v1647_v56 = vshll.u32 %v1631_v47, 16  ;;  %v698_v6 = vrot.slane %v1601_v29, 3 }
  0x3e   : > { %v403_v17 = vrot.slane %v1637_v51, 2  ;;  %v535_v26 = vrot.slane %v1611_v37, 1  ;;  %v536_v8 = vrot.slane %v1623_v44, 1 }
  0x3f   : > { %v531_v2 = vrot.slane %v1641_v53, 1  ;;  %v393_v3 = vrot.slane %v1647_v56, 1 }
  0x40   : > { %333 = vrot.lane.b32.xlu1 %v332_v42, %s1370_s27  ;;  %469 = vrot.lane.b32.xlu0 %v468_v43, %s1368_s25  ;;  %v678_v42 = vrot.slane %v1597_v28, 1  ;;  %v681_v43 = vshrl.u32 %v1581_v7, 16 }
  0x41   : > { %v1659_v14 = vsel %vm302_vm2, %v527_v63, %v531_v2  ;;  %v1666_v16 = vsel %vm302_vm2, %v389_v12, %v393_v3  ;;  %v837_v63 = vor.u32 %v836_v50, %v835_v49  ;;  %v842_v12 = vrot.slane %v1574_v21, 3  ;;  %v1250_v21 = vld [vmem:[%s1908_s1 + $0x10] sm:$0xff] }
  0x42   : > { %v683_v60 = vrot.slane %v681_v43, 1  ;;  %v413_v49 = vrot.slane %v1614_v38, 2  ;;  %v414_v50 = vrot.slane %v1631_v47, 2 }
  0x45   : > { %480 = vrot.lane.b32.xlu2 %v479_v13, %s1370_s27  ;;  %v680_v13 = vor.u32 %v679_v48, %v678_v42  ;;  %v832_v42 = vrot.slane %v1590_v25, 2  ;;  %v833_v48 = vrot.slane %v1577_v15, 3  ;;  %v703_v25 = vrot.slane %v1566_v1, 3 }
  0x46   : > { %v704_v15 = vrot.slane %v1581_v7, 3  ;;  %v405_v7 = vshrl.u32 %v1631_v47, 16 }
  0x48   : > { %485 = vrot.lane.b32.xlu1 %v484_v61, %s1367_s24  ;;  %339 = vrot.lane.b32.xlu0 %v338_v62, %s1367_s24  ;;  %v684_v61 = vrot.slane %v1601_v29, 2  ;;  %v670_v62 = vsel %vm302_vm2, %v665_v40, %v669_v41  ;;  %v829_v40 = vsel %vm335_vm0, %v827_v33, %v828_v34  ;;  %v691_v41 = vsel %vm335_vm0, %v689_v35, %v690_v36 }
  0x49   : > { %v407_v19 = vrot.slane %v405_v7, 1  ;;  %v537_v34 = vsel %vm317_vm1, %v535_v26, %v536_v8  ;;  %v540_v35 = vrot.slane %v1626_v45, 1  ;;  %v541_v36 = vrot.slane %v1629_v46, 2 }
  0x4a   : > { %v685_v5 = vor.u32 %v684_v61, %v683_v60  ;;  %v695_v60 = vrot.slane %v1584_v18, 3  ;;  %v697_v61 = vrot.slane %v681_v43, 2  ;;  %v864_v43 = vld [vmem:[%s1908_s1 + $0x18] sm:$0xf] }
  0x4b   : > { %v878_v3 = vunpack.c.l.b16 %v864_v43 }
  0x4c   : > { %v686_v23 = vsel %vm323_vm3, %v680_v13, %v685_v5  ;;  %v699_v2 = vor.u32 %v698_v6, %v697_v61  ;;  %v402_v5 = vrot.slane %v1644_v54, 1  ;;  %v415_v6 = vsel %vm335_vm0, %v413_v49, %v414_v50 }
  0x4d   : > { %349 = vrot.lane.b32.xlu2 %v348_v32, %s1372_s29  ;;  %v675_v32 = vsel %vm317_vm1, %v673_v11, %v674_v20  ;;  %v882_v13 = vpack.c.b16 %v878_v3, %v878_v3  ;;  %v408_v11 = vrot.slane %v1647_v56, 2 }
  0x4f   : > { %v905_v20 = vsel %vm903_vm6, %v882_v13, 0 }
  0x50   : > { %355 = vrot.lane.b32.xlu1 %v354_v30, %s1371_s28  ;;  %494 = vrot.lane.b32.xlu0 %v493_v31, %s1372_s29  ;;  %v821_v30 = vrot.slane %v819_v22, 1  ;;  %v822_v31 = vrot.slane %v1594_v27, 2 }
  0x51   : > { %1299 = vmatpush.bf16.msra.mxu2 %v905_v20  ;;  %1300 = vmatpush.bf16.msra.mxu3 %v905_v20 }
  0x52   : > { %v823_v39 = vor.u32 %v822_v31, %v821_v30  ;;  %911 = vmatpush.bf16.msra.mxu0 %v905_v20  ;;  %1298 = vmatpush.bf16.msra.mxu1 %v905_v20  ;;  %v397_v30 = vrot.slane %v1614_v38, 1  ;;  %v398_v31 = vrot.slane %v1631_v47, 1 }
  0x54   : > { %v824_v52 = vsel %vm323_vm3, %v818_v10, %v823_v39  ;;  %v546_v39 = vrot.slane %v1641_v53, 2 }
  0x55   : > { %499 = vrot.lane.b32.xlu2 %v498_v4, %s1371_s28  ;;  %v841_v4 = vrot.slane %v1560_v59, 3  ;;  %1302 = vmatpush.bf16.msra.mxu2 %v1250_v21 }
  0x56   : > { %1303 = vmatpush.bf16.msra.mxu3 %v1250_v21  ;;  %912 = vmatpush.bf16.msra.mxu0 %v1250_v21 }
  0x57   : > { %v843_v22 = vsel %vm351_vm4, %v841_v4, %v842_v12  ;;  %1301 = vmatpush.bf16.msra.mxu1 %v1250_v21 }
  0x58   : > { %809 = vrot.lane.b32.xlu1 %v808_v58, %s1369_s26  ;;  %671 = vrot.lane.b32.xlu0 %v670_v62, %s1369_s26  ;;  %v694_v58 = vrot.slane %v1597_v28, 2  ;;  %v834_v62 = vor.u32 %v833_v48, %v832_v42  ;;  %v705_v28 = vsel %vm351_vm4, %v703_v25, %v704_v15  ;;  %v551_v42 = vrot.slane %v1611_v37, 2 }
  0x59   : > { %v552_v48 = vrot.slane %v1623_v44, 2  ;;  %v556_v25 = vrot.slane %v1626_v45, 2  ;;  %v557_v15 = vrot.slane %v1629_v46, 3  ;;  %v427_v45 = vrot.slane %v1614_v38, 3 }
  0x5a   : > { %v696_v27 = vor.u32 %v695_v60, %v694_v58  ;;  %v838_v18 = vsel %vm341_vm5, %v834_v62, %v837_v63  ;;  %v560_v63 = vrot.slane %v1641_v53, 3  ;;  %v428_v46 = vrot.slane %v1631_v47, 3 }
  0x5b   : > { %v553_v61 = vsel %vm335_vm0, %v551_v42, %v552_v48  ;;  %v558_v53 = vor.u32 %v557_v15, %v556_v25 }
  0x5c   : > { %v700_v29 = vsel %vm341_vm5, %v696_v27, %v699_v2  ;;  %v418_v2 = vrot.slane %v1644_v54, 2 }
  0x5d   : > { %676 = vrot.lane.b32.xlu2 %v675_v32, %s1368_s25 }
  0x60   : > { %687 = vrot.lane.b32.xlu1 %v686_v23, %s1370_s27  ;;  %814 = vrot.lane.b32.xlu0 %v813_v24, %s1368_s25  ;;  %v404_v23 = vor.u32 %v403_v17, %v402_v5  ;;  %v409_v24 = vor.u32 %v408_v11, %v407_v19  ;;  %v565_v17 = vrot.slane %v1611_v37, 3  ;;  %v566_v19 = vrot.slane %v1623_v44, 3 }
  0x62   : > { %v410_v33 = vsel %vm323_vm3, %v404_v23, %v409_v24 }
  0x65   : > { %825 = vrot.lane.b32.xlu2 %v824_v52, %s1370_s27  ;;  %v542_v52 = vor.u32 %v541_v36, %v540_v35 }
  0x68   : > { %830 = vrot.lane.b32.xlu1 %v829_v40, %s1367_s24  ;;  %692 = vrot.lane.b32.xlu0 %v691_v41, %s1367_s24  ;;  %v1248_v40 = vld [vmem:[%s1908_s1] sm:$0xff]  ;;  %v399_v41 = vsel %vm317_vm1, %v397_v30, %v398_v31 }
  0x6d   : > { %701 = vrot.lane.b32.xlu2 %v700_v29, %s1372_s29  ;;  %v422_v29 = vrot.slane %v1647_v56, 3 }
  0x70   : > { %706 = vrot.lane.b32.xlu1 %v705_v28, %s1371_s28  ;;  %839 = vrot.lane.b32.xlu0 %v838_v18, %s1372_s29  ;;  %v419_v28 = vrot.slane %v1637_v51, 3  ;;  %v421_v18 = vrot.slane %v405_v7, 2  ;;  %v429_v7 = vsel %vm351_vm4, %v427_v45, %v428_v46 }
  0x72   : > { %v420_v51 = vor.u32 %v419_v28, %v418_v2  ;;  %v423_v4 = vor.u32 %v422_v29, %v421_v18 }
  0x74   : > { %v424_v13 = vsel %vm341_vm5, %v420_v51, %v423_v4 }
  0x75   : > { %844 = vrot.lane.b32.xlu2 %v843_v22, %s1371_s28  ;;  %v567_v22 = vsel %vm351_vm4, %v565_v17, %v566_v19 }
  0x77   : > { %v1729_v32 = vpop.permute.xlu2 %618 }
  0x78   : > { %533 = vrot.lane.b32.xlu1 %v1659_v14, %s1369_s26  ;;  %395 = vrot.lane.b32.xlu0 %v1666_v16, %s1369_s26  ;;  %v543_v14 = vshrl.u32 %v1623_v44, 16  ;;  %v1249_v16 = vld [vmem:[%s1908_s1 + $0x8] sm:$0xff] }
  0x79   : > { %1305 = vmatpush.bf16.msra.mxu2 %v1249_v16  ;;  %1306 = vmatpush.bf16.msra.mxu3 %v1249_v16 }
  0x7a   : > { %v545_v10 = vrot.slane %v543_v14, 1  ;;  %913 = vmatpush.bf16.msra.mxu0 %v1249_v16  ;;  %1304 = vmatpush.bf16.msra.mxu1 %v1249_v16  ;;  %v559_v62 = vrot.slane %v543_v14, 2 }
  0x7c   : > { %v547_v58 = vor.u32 %v546_v39, %v545_v10  ;;  %v561_v43 = vor.u32 %v560_v63, %v559_v62 }
  0x7d   : > { %400 = vrot.lane.b32.xlu2 %v399_v41, %s1368_s25  ;;  %1308 = vmatpush.bf16.msra.mxu2 %v1248_v40 }
  0x7e   : > { %1309 = vmatpush.bf16.msra.mxu3 %v1248_v40  ;;  %914 = vmatpush.bf16.msra.mxu0 %v1248_v40  ;;  %v548_v27 = vsel %vm323_vm3, %v542_v52, %v547_v58  ;;  %v562_v56 = vsel %vm341_vm5, %v558_v53, %v561_v43 }
  0x7f   : > { %v757_v60 = vpop.permute.xlu2 %756  ;;  %1307 = vmatpush.bf16.msra.mxu1 %v1248_v40 }
  0x80   : > { %411 = vrot.lane.b32.xlu1 %v410_v33, %s1370_s27  ;;  %538 = vrot.lane.b32.xlu0 %v537_v34, %s1368_s25 }
  0x85   : > { %549 = vrot.lane.b32.xlu2 %v548_v27, %s1370_s27 }
  0x87   : > { %v633_v12 = vpop.permute.xlu2 %632 }
  0x88   : > { %554 = vrot.lane.b32.xlu1 %v553_v61, %s1367_s24  ;;  %416 = vrot.lane.b32.xlu0 %v415_v6, %s1367_s24 }
  0x8a   : > { %v624_v54 = vpop.permute.xlu0 %623  ;;  %v608_v3 = vpop.permute.xlu1 %607 }
  0x8d   : > { %425 = vrot.lane.b32.xlu2 %v424_v13, %s1372_s29 }
  0x8f   : > { %v776_v11 = vpop.permute.xlu2 %775 }
  0x90   : > { %430 = vrot.lane.b32.xlu1 %v429_v7, %s1371_s28  ;;  %563 = vrot.lane.b32.xlu0 %v562_v56, %s1372_s29 }
  0x92   : > { %v746_v47 = vpop.permute.xlu1 %745  ;;  %v603_v5 = vpop.permute.xlu0 %602 }
  0x93   : > { %v640_v20 = vsel %vm357_vm7, %v1425_v0, %v603_v5 }
  0x94   : > { %v642_v21 = vsel %vm360_vm8, %v640_v20, %v608_v3 }
  0x95   : > { %568 = vrot.lane.b32.xlu2 %v567_v22, %s1371_s28  ;;  %v644_v44 = vsel %vm363_vm9, %v642_v21, %v1729_v32 }
  0x96   : > { %v646_v0 = vsel %vm366_vm10, %v644_v44, %v624_v54 }
  0x97   : > { %v322_v8 = vpop.permute.xlu2 %321  ;;  %v648_v14 = vsel %vm369_vm11, %v646_v0, %v633_v12 }
  0x9a   : > { %v762_v23 = vpop.permute.xlu1 %761  ;;  %v741_v24 = vpop.permute.xlu0 %740 }
  0x9b   : > { %v778_v26 = vsel %vm357_vm7, %v1437_v9, %v741_v24 }
  0x9c   : > { %v780_v30 = vsel %vm360_vm8, %v778_v26, %v746_v47 }
  0x9d   : > { %v782_v31 = vsel %vm363_vm9, %v780_v30, %v757_v60 }
  0x9e   : > { %v784_v33 = vsel %vm366_vm10, %v782_v31, %v762_v23 }
  0x9f   : > { %v481_v32 = vpop.permute.xlu2 %480 }
  0xa2   : > { %v638_v16 = vpop.permute.xlu1 %637  ;;  %v771_v9 = vpop.permute.xlu0 %770 }
  0xa3   : > { %v786_v34 = vsel %vm369_vm11, %v784_v33, %v771_v9  ;;  %v650_v35 = vsel %vm372_vm12, %v648_v14, %v638_v16 }
  0xa4   : > { %1234 = vmatmul.msk.bf16.vlgmr.msra.gmra.mxu2 %vm886_vm13, %v650_v35  ;;  %v788_v36 = vsel %vm372_vm12, %v786_v34, %v776_v11 }
  0xa5   : > { %1236 = vmatmul.msk.bf16.vlgmr.msra.gmra.mxu3 %vm886_vm13, %v788_v36 }
  0xa7   : > { %v350_v40 = vpop.permute.xlu2 %349 }
  0xaa   : > { %v465_v10 = vpop.permute.xlu1 %464  ;;  %v316_v39 = vpop.permute.xlu0 %315 }
  0xab   : > { %v359_v49 = vsel %vm357_vm7, %v1482_v57, %v316_v39  ;;  %v502_v60 = vsel %vm357_vm7, %v1479_v55, %v465_v10 }
  0xac   : > { %v362_v61 = vsel %vm360_vm8, %v359_v49, %v322_v8  ;;  %v1845_v49 = vld [vmem:[%s1909_s2] ss:$0 sm:$0xff] }
  0xaf   : > { %v500_v48 = vpop.permute.xlu2 %499 }
  0xb2   : > { %v334_v41 = vpop.permute.xlu1 %333  ;;  %v470_v42 = vpop.permute.xlu0 %469 }
  0xb3   : > { %v365_v6 = vsel %vm363_vm9, %v362_v61, %v334_v41  ;;  %v504_v25 = vsel %vm360_vm8, %v502_v60, %v470_v42  ;;  %v1852_v60 = vld [vmem:[%s1910_s3] ss:$0 sm:$0xff] }
  0xb4   : > { %v506_v62 = vsel %vm363_vm9, %v504_v25, %v481_v32 }
  0xb7   : > { %v677_v58 = vpop.permute.xlu2 %676 }
  0xba   : > { %v486_v50 = vpop.permute.xlu1 %485  ;;  %v340_v52 = vpop.permute.xlu0 %339 }
  0xbb   : > { %v368_v15 = vsel %vm366_vm10, %v365_v6, %v340_v52  ;;  %v508_v63 = vsel %vm366_vm10, %v506_v62, %v486_v50 }
  0xbc   : > { %v371_v57 = vsel %vm369_vm11, %v368_v15, %v350_v40 }
  0xbf   : > { %v826_v29 = vpop.permute.xlu2 %825 }
  0xc2   : > { %v356_v27 = vpop.permute.xlu1 %355  ;;  %v495_v2 = vpop.permute.xlu0 %494 }
  0xc3   : > { %v510_v28 = vsel %vm369_vm11, %v508_v63, %v495_v2  ;;  %v374_v55 = vsel %vm372_vm12, %v371_v57, %v356_v27 }
  0xc4   : > { %1230 = vmatmul.msk.bf16.vlgmr.msra.gmra.mxu0 %vm886_vm13, %v374_v55  ;;  %v512_v18 = vsel %vm372_vm12, %v510_v28, %v500_v48 }
  0xc5   : > { %1232 = vmatmul.msk.bf16.vlgmr.msra.gmra.mxu1 %vm886_vm13, %v512_v18 }
  0xc7   : > { %v702_v53 = vpop.permute.xlu2 %701 }
  0xca   : > { %v810_v45 = vpop.permute.xlu1 %809  ;;  %v672_v46 = vpop.permute.xlu0 %671 }
  0xcb   : > { %v709_v51 = vsel %vm357_vm7, %v1566_v1, %v672_v46  ;;  %v847_v7 = vsel %vm357_vm7, %v1560_v59, %v810_v45 }
  0xcc   : > { %v711_v56 = vsel %vm360_vm8, %v709_v51, %v677_v58 }
  0xcf   : > { %v845_v3 = vpop.permute.xlu2 %844 }
  0xd2   : > { %v688_v43 = vpop.permute.xlu1 %687  ;;  %v815_v54 = vpop.permute.xlu0 %814 }
  0xd3   : > { %v713_v13 = vsel %vm363_vm9, %v711_v56, %v688_v43  ;;  %v849_v47 = vsel %vm360_vm8, %v847_v7, %v815_v54 }
  0xd4   : > { %v851_v17 = vsel %vm363_vm9, %v849_v47, %v826_v29 }
  0xd7   : > { %v401_v21 = vpop.permute.xlu2 %400 }
  0xda   : > { %v831_v4 = vpop.permute.xlu1 %830  ;;  %v693_v12 = vpop.permute.xlu0 %692 }
  0xdb   : > { %v715_v5 = vsel %vm366_vm10, %v713_v13, %v693_v12  ;;  %v853_v19 = vsel %vm366_vm10, %v851_v17, %v831_v4 }
  0xdc   : > { %v717_v11 = vsel %vm369_vm11, %v715_v5, %v702_v53 }
  0xdf   : > { %v550_v8 = vpop.permute.xlu2 %549 }
  0xe2   : > { %v707_v1 = vpop.permute.xlu1 %706  ;;  %v840_v20 = vpop.permute.xlu0 %839 }
  0xe3   : > { %v855_v22 = vsel %vm369_vm11, %v853_v19, %v840_v20  ;;  %v719_v59 = vsel %vm372_vm12, %v717_v11, %v707_v1 }
  0xe4   : > { %1235 = vmatmul.msk.bf16.gmra.mxu2 %vm886_vm13, %v719_v59  ;;  %v857_v23 = vsel %vm372_vm12, %v855_v22, %v845_v3 }
  0xe5   : > { %1237 = vmatmul.msk.bf16.gmra.mxu3 %vm886_vm13, %v857_v23 }
  0xe7   : > { %v426_v0 = vpop.permute.xlu2 %425 }
  0xea   : > { %v534_v24 = vpop.permute.xlu1 %533  ;;  %v396_v26 = vpop.permute.xlu0 %395 }
  0xeb   : > { %v433_v31 = vsel %vm357_vm7, %v1614_v38, %v396_v26  ;;  %v571_v33 = vsel %vm357_vm7, %v1611_v37, %v534_v24 }
  0xec   : > { %v435_v9 = vsel %vm360_vm8, %v433_v31, %v401_v21 }
  0xef   : > { %v569_v10 = vpop.permute.xlu2 %568 }
  0xf2   : > { %v412_v44 = vpop.permute.xlu1 %411  ;;  %v539_v30 = vpop.permute.xlu0 %538 }
  0xf3   : > { %v437_v34 = vsel %vm363_vm9, %v435_v9, %v412_v44  ;;  %v573_v35 = vsel %vm360_vm8, %v571_v33, %v539_v30 }
  0xf4   : > { %v575_v36 = vsel %vm363_vm9, %v573_v35, %v550_v8 }
  0xfa   : > { %v555_v14 = vpop.permute.xlu1 %554  ;;  %v417_v16 = vpop.permute.xlu0 %416 }
  0xfb   : > { %v439_v32 = vsel %vm366_vm10, %v437_v34, %v417_v16  ;;  %v577_v39 = vsel %vm366_vm10, %v575_v36, %v555_v14 }
  0xfc   : > { %v441_v38 = vsel %vm369_vm11, %v439_v32, %v426_v0 }
 0x102   : > { %v431_v40 = vpop.permute.xlu1 %430  ;;  %v564_v41 = vpop.permute.xlu0 %563 }
 0x103   : > { %v579_v37 = vsel %vm369_vm11, %v577_v39, %v564_v41  ;;  %v443_v42 = vsel %vm372_vm12, %v441_v38, %v431_v40 }
 0x104   : > { %1231 = vmatmul.msk.bf16.gmra.mxu0 %vm886_vm13, %v443_v42  ;;  %v581_v48 = vsel %vm372_vm12, %v579_v37, %v569_v10 }
 0x105   : > { %1233 = vmatmul.msk.bf16.gmra.mxu1 %vm886_vm13, %v581_v48 }
 0x127   : > { %v936_v50 = vpop.f32.mrf.mxu2 }
 0x128   : > { %v946_v52 = vpop.f32.mrf.mxu3  ;;  %v968_v58 = vmul.f32 %v1845_v49, %v936_v50 }
 0x129   : > { %v972_v61 = vmul.f32 %v1845_v49, %v946_v52 }
 0x12a   : > { %v988_v6 = vadd.f32 %v1852_v60, %v968_v58 }
 0x12b   : > { %v992_v25 = vadd.f32 %v1852_v60, %v972_v61 }
 0x12c   : > { %v1004_v27 = vmax.f32 %v988_v6, 0.0 }
 0x12d   : > { %v1008_v28 = vmax.f32 %v992_v25, 0.0 }
 0x12e   : > { %v1020_v45 = vmin.f32 %v1004_v27, 6.0 }
 0x12f   : > { %v938_v15 = vpop.f32.mrf.mxu2  ;;  %v1024_v53 = vmin.f32 %v1008_v28, 6.0 }
 0x130   : > { %v969_v62 = vmul.f32 %v1845_v49, %v938_v15  ;;  %v948_v63 = vpop.f32.mrf.mxu3 }
 0x131   : > { %v973_v57 = vmul.f32 %v1845_v49, %v948_v63 }
 0x132   : > { %v989_v2 = vadd.f32 %v1852_v60, %v969_v62 }
 0x133   : > { %v993_v55 = vadd.f32 %v1852_v60, %v973_v57 }
 0x134   : > { %v1005_v18 = vmax.f32 %v989_v2, 0.0 }
 0x135   : > { %v1009_v29 = vmax.f32 %v993_v55, 0.0 }
 0x136   : > { %v1021_v46 = vmin.f32 %v1005_v18, 6.0 }
 0x137   : > { %v1025_v43 = vmin.f32 %v1009_v29, 6.0 }
 0x138   : > { %v1274_v54 = vpack.c.bf16 %v1021_v46, %v1020_v45 }
 0x139   : > { %v1284_v3 = vpack.c.bf16 %v1025_v43, %v1024_v53 }
 0x13a   : > { %1294 = vst [vmem:[%s1864_s23 + $0x20] sm:$0xff] %v1274_v54  }
 0x13b   : > { %1296 = vst [vmem:[%s1864_s23 + $0x30] sm:$0xff] %v1284_v3  }
 0x141   : > { %v916_v51 = vpop.f32.mrf.mxu0 }
 0x142   : > { %v926_v4 = vpop.f32.mrf.mxu1  ;;  %v960_v12 = vmul.f32 %v1845_v49, %v916_v51 }
 0x143   : > { %v964_v7 = vmul.f32 %v1845_v49, %v926_v4 }
 0x144   : > { %v980_v56 = vadd.f32 %v1852_v60, %v960_v12 }
 0x145   : > { %v984_v13 = vadd.f32 %v1852_v60, %v964_v7 }
 0x146   : > { %v996_v11 = vmax.f32 %v980_v56, 0.0 }
 0x147   : > { %v1000_v20 = vmax.f32 %v984_v13, 0.0 }
 0x148   : > { %v1012_v23 = vmin.f32 %v996_v11, 6.0 }
 0x149   : > { %v918_v47 = vpop.f32.mrf.mxu0  ;;  %v1016_v26 = vmin.f32 %v1000_v20, 6.0 }
 0x14a   : > { %v961_v5 = vmul.f32 %v1845_v49, %v918_v47  ;;  %v928_v17 = vpop.f32.mrf.mxu1 }
 0x14b   : > { %v965_v19 = vmul.f32 %v1845_v49, %v928_v17 }
 0x14c   : > { %v981_v1 = vadd.f32 %v1852_v60, %v961_v5 }
 0x14d   : > { %v985_v22 = vadd.f32 %v1852_v60, %v965_v19 }
 0x14e   : > { %v997_v59 = vmax.f32 %v981_v1, 0.0 }
 0x14f   : > { %v1001_v21 = vmax.f32 %v985_v22, 0.0 }
 0x150   : > { %v1013_v24 = vmin.f32 %v997_v59, 6.0 }
 0x151   : > { %v1017_v8 = vmin.f32 %v1001_v21, 6.0 }
 0x152   : > { %v1254_v44 = vpack.c.bf16 %v1013_v24, %v1012_v23 }
 0x153   : > { %v1264_v30 = vpack.c.bf16 %v1017_v8, %v1016_v26 }
 0x154   : > { %1255 = vst [vmem:[%s1864_s23] sm:$0xff] %v1254_v44  }
 0x155   : > { %1292 = vst [vmem:[%s1864_s23 + $0x10] sm:$0xff] %v1264_v30  }
 0x167   : > { %v941_v0 = vpop.f32.mrf.mxu2 }
 0x168   : > { %v951_v31 = vpop.f32.mrf.mxu3  ;;  %v970_v14 = vmul.f32 %v1845_v49, %v941_v0 }
 0x169   : > { %v974_v16 = vmul.f32 %v1845_v49, %v951_v31 }
 0x16a   : > { %v990_v33 = vadd.f32 %v1852_v60, %v970_v14 }
 0x16b   : > { %v994_v9 = vadd.f32 %v1852_v60, %v974_v16 }
 0x16c   : > { %v1006_v10 = vmax.f32 %v990_v33, 0.0 }
 0x16d   : > { %v1010_v38 = vmax.f32 %v994_v9, 0.0 }
 0x16e   : > { %v1022_v42 = vmin.f32 %v1006_v10, 6.0 }
 0x16f   : > { %v943_v34 = vpop.f32.mrf.mxu2  ;;  %v1026_v50 = vmin.f32 %v1010_v38, 6.0 }
 0x170   : > { %v971_v35 = vmul.f32 %v1845_v49, %v943_v34  ;;  %v953_v32 = vpop.f32.mrf.mxu3 }
 0x171   : > { %v975_v36 = vmul.f32 %v1845_v49, %v953_v32 }
 0x172   : > { %v991_v39 = vadd.f32 %v1852_v60, %v971_v35 }
 0x173   : > { %v995_v40 = vadd.f32 %v1852_v60, %v975_v36 }
 0x174   : > { %v1007_v41 = vmax.f32 %v991_v39, 0.0 }
 0x175   : > { %v1011_v37 = vmax.f32 %v995_v40, 0.0 }
 0x176   : > { %v1023_v48 = vmin.f32 %v1007_v41, 6.0 }
 0x177   : > { %v1027_v52 = vmin.f32 %v1011_v37, 6.0 }
 0x178   : > { %v1279_v58 = vpack.c.bf16 %v1023_v48, %v1022_v42 }
 0x179   : > { %v1289_v61 = vpack.c.bf16 %v1027_v52, %v1026_v50 }
 0x17a   : > { %1295 = vst [vmem:[%s1864_s23 + $0x28] sm:$0xff] %v1279_v58  }
 0x17b   : > { %1297 = vst [vmem:[%s1864_s23 + $0x38] sm:$0xff] %v1289_v61  }
 0x181   : > { %v921_v6 = vpop.f32.mrf.mxu0 }
 0x182   : > { %v931_v25 = vpop.f32.mrf.mxu1  ;;  %v962_v15 = vmul.f32 %v1845_v49, %v921_v6 }
 0x183   : > { %v966_v62 = vmul.f32 %v1845_v49, %v931_v25 }
 0x184   : > { %v982_v63 = vadd.f32 %v1852_v60, %v962_v15 }
 0x185   : > { %v986_v57 = vadd.f32 %v1852_v60, %v966_v62 }
 0x186   : > { %v998_v18 = vmax.f32 %v982_v63, 0.0 }
 0x187   : > { %v1002_v45 = vmax.f32 %v986_v57, 0.0 }
 0x188   : > { %v1014_v54 = vmin.f32 %v998_v18, 6.0 }
 0x189   : > { %v923_v27 = vpop.f32.mrf.mxu0  ;;  %v1018_v51 = vmin.f32 %v1002_v45, 6.0 }
 0x18a   : > { %v963_v2 = vmul.f32 %v1845_v49, %v923_v27  ;;  %v933_v28 = vpop.f32.mrf.mxu1 }
 0x18b   : > { %v967_v55 = vmul.f32 %v1845_v49, %v933_v28 }
 0x18c   : > { %v983_v29 = vadd.f32 %v1852_v60, %v963_v2 }
 0x18d   : > { %v987_v46 = vadd.f32 %v1852_v60, %v967_v55 }
 0x18e   : > { %v999_v53 = vmax.f32 %v983_v29, 0.0 }
 0x18f   : > { %v1003_v43 = vmax.f32 %v987_v46, 0.0 }
 0x190   : > { %v1015_v3 = vmin.f32 %v999_v53, 6.0 }
 0x191   : > { %v1019_v4 = vmin.f32 %v1003_v43, 6.0 }
 0x192   : > { %v1259_v12 = vpack.c.bf16 %v1015_v3, %v1014_v54 }
 0x193   : > { %v1269_v7 = vpack.c.bf16 %v1019_v4, %v1018_v51 }
 0x194   : > { %1291 = vst [vmem:[%s1864_s23 + $0x8] sm:$0xff] %v1259_v12  }
 0x195   : > { %1293 = vst [vmem:[%s1864_s23 + $0x18] sm:$0xff] %v1269_v7  }
 0x196 PF: > { %s14_s17 = sadd.s32 1, %s1365_s17   ;;  %s1912_s15 = smov %s1361_s16 }
 0x197   : > { %p11_p6 = scmp.ge.s32.totalorder %s14_s17, 6   ;;  %s1913_s16 = smov %s1915_s18 }
 0x199   :  { %13 = sbr.rel (!%p11_p6) target bundleno = 2 (0x2), region = 75 }

// kernel: inception_v3_module_e.10
= control target key start
LH: loop header
LB: loop body
LE: loop exit
PB: predicated region body
PF: predicated region fallthrough
CT: control target
= control target key end

     0   :  { %s1245_s30 = smov 0   ;;  %s1247_s10 = smov 0   ;;  %s1356_s0 = inlined_call_operand.vmem [shape: bf16[2,16,8,8], index: 0, kind: input, shape index: {}, may-alias: {0,2,4}]   ;;  %s1357_s1 = inlined_call_operand.vmem [shape: bf16[2,16,8,8], index: 1, kind: input, shape index: {}, may-alias: {1,3,5}]   ;;  %s1358_s2 = inlined_call_operand.vmem [shape: bf16[2,16,8,8], index: 2, kind: input, shape index: {}, may-alias: {0,2,4}]   ;;  %s1359_s3 = inlined_call_operand.vmem [shape: bf16[2,16,8,8], index: 3, kind: input, shape index: {}, may-alias: {1,3,5}]   ;;  %s1360_s4 = inlined_call_operand.vmem [shape: bf16[2,16,8,8], index: 4, kind: input, shape index: {}, may-alias: {0,2,4}]   ;;  %s1361_s5 = inlined_call_operand.vmem [shape: bf16[2,16,8,8], index: 5, kind: input, shape index: {}, may-alias: {1,3,5}]   ;;  %s1362_s6 = inlined_call_operand.vmem [shape: bf16[72,128], index: 6, kind: input, shape index: {}]   ;;  %s1363_s7 = inlined_call_operand.vmem [shape: f32[1,128], index: 7, kind: input, shape index: {}]   ;;  %s1364_s8 = inlined_call_operand.vmem [shape: f32[1,128], index: 8, kind: input, shape index: {}]   ;;  %s1365_s9 = inlined_call_operand.vmem [shape: f32[2,7,7,128], index: 9, kind: output, shape index: {}]  }
   0x1   :  { %s1249_s11 = smov 0   ;;  %s1251_s12 = smov 0  }
   0x2   :  { %s1253_s13 = smov 0  }
   0x3 LB: > { %s34_s14 = sadd.s32 1, %s1177_s11  ;;  %s38_s15 = sadd.s32 1, %s1181_s12  ;;  %s1185_s13 = sphi %s1253_s13, %s19_s13   ;;  %s1181_s12 = sphi %s1251_s12, %s1369_s12   ;;  %s1177_s11 = sphi %s1249_s11, %s1368_s11   ;;  %s1173_s10 = sphi %s1247_s10, %s1367_s10   ;;  %s1169_s30 = sphi %s1245_s30, %s1366_s30  }
   0x4   : > { %p36_p0 = scmp.ge.s32.totalorder %s34_s14, 7  ;;  %p1053_p1 = scmp.ge.s32.totalorder %s1185_s13, 1 }
   0x5   : > { %p455_p2 = scmp.lt.s32.totalorder %s1185_s13, 15 }
   0x6   : > { %s1371_s14 = smov (%p36_p0, %s34_s14), 0  ;;  %s1373_s15 = smov (!%p36_p0, %s38_s15), %s1181_s12 }
   0x7   : > { %p456_p3 = pnand %p1053_p1, %p455_p2  ;;  %p40_p4 = scmp.ge.s32.totalorder %s1373_s15, 2 }
   0x8   : > { %s1278_s16 = sshll.u32 (!%p456_p3), %s1169_s30, 1  ;;  %p561_p5 = scmp.lt.s32.totalorder (!%p456_p3), %s1173_s10, 1 }
   0x9   : > { %s1375_s15 = smov (%p40_p4, %s1373_s15), 0  ;;  %459 = sbr.rel (%p456_p3) target bundleno = 294 (0x126), region = 56 }
   0xa   : > { %p563_p6 = scmp.lt.s32.totalorder (!%p456_p3), %s1278_s16, 15  ;;  %s581_s21 = sadd.s32 (!%p456_p3), 1, %s1278_s16 }
   0xb   : > { %p584_p7 = scmp.lt.s32.totalorder (!%p456_p3), %s581_s21, 15  ;;  %s605_s18 = sadd.s32 (!%p456_p3), 2, %s1278_s16 }
   0xc   : > { %p608_p8 = scmp.lt.s32.totalorder (!%p456_p3), %s605_s18, 15  ;;  %s1187_s28 = smov (!%p456_p3), 8  }
   0xd   : > { %p640_p9 = scmp.lt.s32.totalorder (!%p456_p3), %s1169_s30, 6 }
   0xe   : > { %s1377_s10 = smov (!%p561_p5, %s1173_s10), 1  ;;  %v744_v0 = vld [vmem:[%s1362_s6 + $0x20] sm:$0xf]  ;;  %vm775_vm0 = vcmask 1043456   ;;  %s1379_s21 = smov (!%p584_p7, %s581_s21), 15  ;;  %v1095_v34 = vld [vmem:[%s1362_s6 + $0x18] sm:$0xff] }
   0xf   : > { %s564_s19 = scalar_select %p563_p6, %s1278_s16, 15  ;;  %v762_v1 = vunpack.c.l.b16 %v744_v0  ;;  %v1094_v35 = vld [vmem:[%s1362_s6 + $0x10] sm:$0xff]  ;;  %v1093_v36 = vld [vmem:[%s1362_s6 + $0x8] sm:$0xff]  ;;  %v1092_v37 = vld [vmem:[%s1362_s6] sm:$0xff]  ;;  %vm711_vm1 = vcmask 64512   ;;  %vm715_vm2 = vcmask 130048  }
  0x10   : > { %s1288_s20 = sshll.u32 %s1377_s10, 4  ;;  %s1381_s18 = smov (!%p608_p8, %s605_s18), 15  ;;  %vm718_vm3 = vcmask 195584   ;;  %vm721_vm4 = vcmask 261120   ;;  %vm724_vm5 = vcmask 326656   ;;  %vm727_vm6 = vcmask 392192  }
  0x11   : > { %s566_s22 = sadd.s32 %s1288_s20, %s564_s19  ;;  %v767_v2 = vpack.c.b16 %v762_v1, %v762_v1  ;;  %s587_s17 = sadd.s32 %s1288_s20, %s1379_s21  ;;  %vm730_vm7 = vcmask 457728   ;;  %vm733_vm8 = vcmask 523264   ;;  %vm772_vm9 = vcmask 588800   ;;  %v1145_v54 = vld [vmem:[%s1363_s7] ss:$0 sm:$0xff] }
  0x12   : > { %s1056_s23 = sshll.u32 %s566_s22, 2  ;;  %s1062_s19 = sshll.u32 %s587_s17, 2  ;;  %v1146_v55 = vld [vmem:[%s1364_s8] ss:$0 sm:$0xff] }
  0x13   : > { %s578_s26 = scalar_lea.vmem %s1357_s1, %s1056_s23  ;;  %s568_s29 = scalar_lea.vmem %s1356_s0, %s1056_s23  ;;  %v777_v3 = vsel %vm775_vm0, %v767_v2, 0 }
  0x14   : > { %v651_v4 = vld [vmem:[%s578_s26] sm:$0xf]  ;;  %782 = vmatpush.bf16.msra.mxu0 %v777_v3  ;;  %s589_s23 = scalar_lea.vmem %s1358_s2, %s1062_s19  ;;  %s601_s27 = scalar_lea.vmem %s1359_s3, %s1062_s19 }
  0x15   : > { %v1298_v5 = vld [vmem:[%s568_s29] sm:$0xf]  ;;  %v657_v6 = vunpack.c.l.b16 %v651_v4  ;;  %s611_s16 = sadd.s32 %s1288_s20, %s1381_s18  ;;  %s1188_s29 = smov 24  }
  0x16   : > { %v662_v7 = vunpack.c.l.b16 %v1298_v5  ;;  %v652_v10 = vld [vmem:[%s589_s23] sm:$0xf]  ;;  %s1068_s21 = sshll.u32 %s611_s16, 2  ;;  %s1189_s20 = smov 16  }
  0x17   : > { %v658_v8 = vpack.c.b16 %v657_v6, %v657_v6  ;;  %v674_v13 = vunpack.c.l.b16 %v652_v10  ;;  %v653_v15 = vld [vmem:[%s601_s27] sm:$0xf]  ;;  %s613_s19 = scalar_lea.vmem %s1360_s4, %s1068_s21  ;;  %s625_s23 = scalar_lea.vmem %s1361_s5, %s1068_s21 }
  0x18   : > { %v663_v9 = vpack.c.b16 %v662_v7, %v662_v7  ;;  %v679_v18 = vunpack.c.l.b16 %v653_v15  ;;  %v654_v21 = vld [vmem:[%s613_s19] sm:$0xf]  ;;  %s1190_s18 = smov 40   ;;  %s1191_s26 = smov 32   ;;  %783 = vmatpush.bf16.msra.mxu0 %v1095_v34 }
  0x19   : > { %659 = vrot.lane.b32.xlu0 %v658_v8, %s1187_s28  ;;  %v675_v16 = vpack.c.b16 %v674_v13, %v674_v13  ;;  %v655_v22 = vld [vmem:[%s625_s23] sm:$0xf]  ;;  %v693_v23 = vunpack.c.l.b16 %v654_v21  ;;  %s1192_s27 = smov 56   ;;  %s1193_s28 = smov 48  }
  0x1a   : > { %v665_v11 = vshrl.u32 %v663_v9, 16  ;;  %v667_v12 = vshll.u32 %v663_v9, 16  ;;  %v698_v25 = vunpack.c.l.b16 %v655_v22  ;;  %v680_v26 = vpack.c.b16 %v679_v18, %v679_v18  ;;  %s1194_s16 = smov 64   ;;  %s1383_s30 = smov (!%p640_p9, %s1169_s30), 6 }
  0x1b   : > { %676 = vrot.lane.b32.xlu1 %v675_v16, %s1188_s29  ;;  %v684_v19 = vshrl.u32 %v675_v16, 16  ;;  %v686_v20 = vshll.u32 %v675_v16, 16  ;;  %v694_v27 = vpack.c.b16 %v693_v23, %v693_v23 }
  0x1c   : > { %v669_v14 = vrot.slane %v667_v12, 1  ;;  %v699_v30 = vpack.c.b16 %v698_v25, %v698_v25  ;;  %784 = vmatpush.bf16.msra.mxu0 %v1094_v35 }
  0x1d   : > { %v688_v24 = vrot.slane %v686_v20, 1  ;;  %v705_v29 = vshll.u32 %v694_v27, 16  ;;  %v703_v31 = vshrl.u32 %v694_v27, 16 }
  0x1e   : > { %v670_v17 = vor.u32 %v669_v14, %v665_v11 }
  0x1f   : > { %v689_v28 = vor.u32 %v688_v24, %v684_v19  ;;  %v707_v32 = vrot.slane %v705_v29, 1 }
  0x20   : > { %785 = vmatpush.bf16.msra.mxu0 %v1093_v36 }
  0x21   : > { %671 = vrot.lane.b32.xlu0 %v670_v17, %s1189_s20  ;;  %690 = vrot.lane.b32.xlu2 %v689_v28, %s1190_s18  ;;  %v708_v33 = vor.u32 %v707_v32, %v703_v31  ;;  %s1096_s20 = smul.u32 7, %s1377_s10 }
  0x23   : > { %681 = vrot.lane.b32.xlu1 %v680_v26, %s1191_s26 }
  0x24   : > { %786 = vmatpush.bf16.msra.mxu0 %v1092_v37 }
  0x29   : > { %700 = vrot.lane.b32.xlu0 %v699_v30, %s1192_s27  ;;  %695 = vrot.lane.b32.xlu2 %v694_v27, %s1193_s28 }
  0x2b   : > { %709 = vrot.lane.b32.xlu1 %v708_v33, %s1194_s16  ;;  %s646_s16 = sadd.s32 %s1096_s20, %s1383_s30 }
  0x2c   : > { %s1072_s21 = sshll.u32 %s646_s16, 3 }
  0x2d   : > { %s648_s22 = scalar_lea.vmem %s1365_s9, %s1072_s21 }
  0x7b   : > { %v691_v40 = vpop.permute.xlu2 %690 }
  0x83   : > { %v696_v47 = vpop.permute.xlu2 %695 }
  0x8b   : > { %v660_v38 = vpop.permute.xlu0 %659 }
  0x8c   : > { %v714_v41 = vsel %vm711_vm1, %v1298_v5, %v660_v38 }
  0x8d   : > { %v677_v39 = vpop.permute.xlu1 %676 }
  0x93   : > { %v672_v42 = vpop.permute.xlu0 %671 }
  0x94   : > { %v717_v43 = vsel %vm715_vm2, %v714_v41, %v672_v42 }
  0x95   : > { %v720_v44 = vsel %vm718_vm3, %v717_v43, %v677_v39  ;;  %v682_v45 = vpop.permute.xlu1 %681 }
  0x96   : > { %v723_v46 = vsel %vm721_vm4, %v720_v44, %v682_v45 }
  0x97   : > { %v726_v48 = vsel %vm724_vm5, %v723_v46, %v691_v40 }
  0x98   : > { %v729_v50 = vsel %vm727_vm6, %v726_v48, %v696_v47 }
  0x9b   : > { %v701_v49 = vpop.permute.xlu0 %700 }
  0x9c   : > { %v732_v51 = vsel %vm730_vm7, %v729_v50, %v701_v49 }
  0x9d   : > { %v710_v52 = vpop.permute.xlu1 %709 }
  0x9e   : > { %v735_v53 = vsel %vm733_vm8, %v732_v51, %v710_v52 }
  0x9f   : > { %1089 = vmatmul.msk.bf16.vlgmr.msra.gmra.mxu0 %vm772_vm9, %v735_v53 }
 0x11c   : > { %v788_v56 = vpop.f32.mrf.mxu0 }
 0x11d   : > { %v796_v57 = vmul.f32 %v1145_v54, %v788_v56 }
 0x11f   : > { %v801_v58 = vadd.f32 %v1146_v55, %v796_v57 }
 0x121   : > { %v802_v59 = vmax.f32 %v801_v58, 0.0 }
 0x123   : > { %v803_v60 = vmin.f32 %v802_v59, 6.0 }
 0x124   : > { %v790_v61 = vpop.f32.mrf.mxu0 }
 0x125   : > { %804 = vst [vmem:[%s648_s22] sm:$0x7f] %v803_v60 }
 0x126 PF: > { %s19_s13 = sadd.s32 1, %s1185_s13   ;;  %s1366_s30 = smov %s1177_s11 }
 0x127   : > { %p16_p10 = scmp.ge.s32.totalorder %s19_s13, 16   ;;  %s1367_s10 = smov %s1181_s12 }
 0x128   : > { %s1368_s11 = smov %s1371_s14  ;;  %s1369_s12 = smov %s1375_s15 }
 0x129   :  { %18 = sbr.rel (!%p16_p10) target bundleno = 3 (0x3), region = 110 }

</bundles_post_ra>
